<compile_context>
chip_gen: v6e
topology: v6e:2x2x1
jax: 0.10.0
libtpu: 0.0.40
codegen_flags: <defaults>
</compile_context>

<pallas_src>
import functools
import math

import jax
import jax.numpy as jnp
from jax.experimental import pallas as pl
from jax.experimental.pallas import tpu as pltpu


def _dot(a, b):
    return jnp.dot(a, b, preferred_element_type=jnp.float32)


def _dot_nt(a, b):
    # (m, d) x (n, d) -> (m, n): contract last dims of both, no transpose materialized.
    return jax.lax.dot_general(a, b, (((1,), (1,)), ((), ())),
                               preferred_element_type=jnp.float32)


def _layer_norm(x, gamma, beta, eps):
    mu = jnp.mean(x, axis=-1, keepdims=True)
    var = jnp.mean(jnp.square(x - mu), axis=-1, keepdims=True)
    return (x - mu) * jax.lax.rsqrt(var + eps) * gamma + beta


def encoder_layer_kernel(xq_ref, xk_ref, mask_ref,
                         wq_ref, wkv_ref, wo_ref,
                         w1_ref, b1_ref, w2_ref, b2_ref,
                         g1_ref, be1_ref, g2_ref, be2_ref,
                         out_ref,
                         m_ref, l_ref, acc_ref,
                         *, n_head, d_k, d_v, eps):
    H = n_head
    cd = wq_ref.dtype                       # MXU compute dtype (f32 or bf16)
    ki = pl.program_id(2)
    nk = pl.num_programs(2)

    # ---- init online-softmax state for this (batch, q-tile) -----------------
    @pl.when(ki == 0)
    def _init():
        m_ref[...] = jnp.full(m_ref.shape, -jnp.inf, jnp.float32)
        l_ref[...] = jnp.zeros(l_ref.shape, jnp.float32)
        acc_ref[...] = jnp.zeros(acc_ref.shape, jnp.float32)

    # ---- projections (Q for the query tile, fused K|V for this key chunk) ---
    q = _dot(xq_ref[0].astype(cd), wq_ref[...]).astype(cd)    # (bq, H*dk)
    kv = _dot(xk_ref[0], wkv_ref[...]).astype(cd)             # (bk, H*(dk+dv))

    # Additive key-padding mask, computed once per chunk (NOT per head), f32.
    bias = jnp.where(mask_ref[0] == 0, jnp.float32(-1e9), jnp.float32(0.0))  # (1, bk)
    scale = jnp.float32(1.0 / math.sqrt(d_k))

    # ---- per-head flash update (state in scratch, no concat) ----------------
    for h in range(H):                                        # static unroll, H small
        q_h = q[:, h * d_k:(h + 1) * d_k]                     # (bq, dk)
        k_h = kv[:, h * d_k:(h + 1) * d_k]                    # (bk, dk)
        v_h = kv[:, H * d_k + h * d_v: H * d_k + (h + 1) * d_v]  # (bk, dv)

        s = _dot_nt(q_h, k_h) * scale + bias                  # (bq, bk), f32
        m_prev = m_ref[h]                                     # (bq, 1)
        m_new = jnp.maximum(m_prev, jnp.max(s, axis=-1, keepdims=True))
        alpha = jnp.exp(m_prev - m_new)
        p = jnp.exp(s - m_new)
        l_ref[h] = alpha * l_ref[h] + jnp.sum(p, axis=-1, keepdims=True)
        acc_ref[h] = alpha * acc_ref[h] + _dot(p.astype(cd), v_h)
        m_ref[h] = m_new

    # ---- finalize: output proj + residual + LN + FFN + LN -------------------
    @pl.when(ki == nk - 1)
    def _finalize():
        x32 = xq_ref[0].astype(jnp.float32)                   # exact f32 residual
        attn = jnp.zeros_like(x32)                            # (bq, D)
        for h in range(H):
            inv_l = pl.reciprocal(l_ref[h], approx=True)      # EUP, off the VALU path
            o_h = (acc_ref[h] * inv_l).astype(cd)             # (bq, dv)
            attn = attn + _dot(o_h, wo_ref[h * d_v:(h + 1) * d_v, :])

        # LayerNorm eps: reference Transformer implementation uses 1e-6
        # (PyTorch nn.LayerNorm default would be 1e-5; configurable via `eps`).
        h1 = _layer_norm(attn + x32, g1_ref[...], be1_ref[...], eps)

        f = jnp.maximum(_dot(h1.astype(cd), w1_ref[...]) + b1_ref[...], 0.0)
        f = _dot(f.astype(cd), w2_ref[...]) + b2_ref[...]
        o = _layer_norm(f + h1, g2_ref[...], be2_ref[...], eps)
        out_ref[0] = o.astype(out_ref.dtype)


def encoder_layer(x, slf_attn_mask, params, *, n_head, d_k, d_v,
                  block_q=128, block_k=128, compute_dtype=jnp.float32, eps=1e-6):
    B, L, D = x.shape
    H = n_head

    # Key-padding mask: accept (B, L) or the module's pre-broadcast (B, L, L)
    # (rows identical along the query axis for encoder self-attention).
    # TODO(synk): a general per-query (B, L, L) mask would need a (b, qi, ki)
    # indexed mask BlockSpec instead of this (B, 1, L) key mask.
    key_mask = slf_attn_mask[:, 0, :] if slf_attn_mask.ndim == 3 else slf_attn_mask
    key_mask = key_mask.astype(jnp.int32).reshape(B, 1, L)

    block_q = min(block_q, L)
    block_k = min(block_k, L)
    assert L % block_q == 0 and L % block_k == 0, "seq_len must divide the tile sizes"
    nq, nk = L // block_q, L // block_k

    cd = compute_dtype
    xc = x.astype(cd)                                              # K/V stream (bf16 halves HBM bytes)
    wq = params["wq"].astype(cd)                                   # (D, H*dk)
    wkv = jnp.concatenate([params["wk"], params["wv"]], axis=1).astype(cd)  # (D, H*(dk+dv))
    wo = params["wo"].astype(cd)                                   # (H*dv, D)
    w1 = params["w1"].astype(cd)
    w2 = params["w2"].astype(cd)
    # Biases / LayerNorm params stay f32 — elementwise math is kept in f32.
    b1, b2 = params["b1"], params["b2"]
    g1, be1, g2, be2 = params["g1"], params["be1"], params["g2"], params["be2"]

    kern = functools.partial(encoder_layer_kernel,
                             n_head=H, d_k=d_k, d_v=d_v, eps=eps)

    def const2d(arr):
        # Constant block index across the whole grid -> fetched once, resident in VMEM.
        return pl.BlockSpec(arr.shape, lambda b, qi, ki: (0, 0))

    weights = [wq, wkv, wo, w1, b1, w2, b2, g1, be1, g2, be2]

    # Explicit VMEM budget, scaled to the part (v7x: 64 MiB physical per TC).
    try:
        cap = pltpu.get_tpu_info().vmem_capacity_bytes
        vmem_limit = min(48 * 1024 * 1024, int(cap * 3 // 4))
    except Exception:
        vmem_limit = None
    cp_kwargs = dict(dimension_semantics=("parallel", "parallel", "arbitrary"))
    if vmem_limit is not None:
        cp_kwargs["vmem_limit_bytes"] = vmem_limit

    return pl.pallas_call(
        kern,
        out_shape=jax.ShapeDtypeStruct((B, L, D), jnp.float32),
        grid=(B, nq, nk),
        in_specs=[
            pl.BlockSpec((1, block_q, D), lambda b, qi, ki: (b, qi, 0)),  # x: query tile (f32, residual)
            pl.BlockSpec((1, block_k, D), lambda b, qi, ki: (b, ki, 0)),  # x: key/value chunk (compute dtype)
            pl.BlockSpec((1, 1, block_k), lambda b, qi, ki: (b, 0, ki)),  # key-padding mask chunk
        ] + [const2d(w) for w in weights],
        out_specs=pl.BlockSpec((1, block_q, D), lambda b, qi, ki: (b, qi, 0)),
        scratch_shapes=[
            pltpu.VMEM((H, block_q, 1), jnp.float32),    # running max  m
            pltpu.VMEM((H, block_q, 1), jnp.float32),    # running denom l
            pltpu.VMEM((H, block_q, d_v), jnp.float32),  # running numerator acc
        ],
        compiler_params=pltpu.CompilerParams(**cp_kwargs),
    )(x, xc, key_mask, *weights)


def reference(x, slf_attn_mask, params, *, n_head, d_k, d_v, eps=1e-6):
    """Pure-JAX reference mirroring the PyTorch module (eval mode)."""
    B, L, D = x.shape
    mask = slf_attn_mask if slf_attn_mask.ndim == 3 else jnp.broadcast_to(
        slf_attn_mask[:, None, :], (B, L, L))
    q = (x @ params["wq"]).reshape(B, L, n_head, d_k).transpose(0, 2, 1, 3)
    k = (x @ params["wk"]).reshape(B, L, n_head, d_k).transpose(0, 2, 1, 3)
    v = (x @ params["wv"]).reshape(B, L, n_head, d_v).transpose(0, 2, 1, 3)
    s = jnp.einsum("bhld,bhmd->bhlm", q, k) / jnp.sqrt(jnp.float32(d_k))
    s = jnp.where(mask[:, None, :, :] == 0, -1e9, s)
    a = jax.nn.softmax(s, axis=-1)
    ctx = jnp.einsum("bhlm,bhmd->bhld", a, v).transpose(0, 2, 1, 3).reshape(B, L, -1)
    h1 = ctx @ params["wo"] + x
    mu = h1.mean(-1, keepdims=True)
    var = ((h1 - mu) ** 2).mean(-1, keepdims=True)
    h1 = (h1 - mu) / jnp.sqrt(var + eps) * params["g1"] + params["be1"]
    f = jnp.maximum(h1 @ params["w1"] + params["b1"], 0.0)
    o = f @ params["w2"] + params["b2"] + h1
    mu2 = o.mean(-1, keepdims=True)
    var2 = ((o - mu2) ** 2).mean(-1, keepdims=True)
    return (o - mu2) / jnp.sqrt(var2 + eps) * params["g2"] + params["be2"]


if __name__ == "__main__":
    B, L = 2, 8
    D, H, d_k, d_v, d_hid = 32, 4, 8, 8, 64

    key = jax.random.PRNGKey(0)
    ks = jax.random.split(key, 16)

    def init(k, shape, fan_in):
        return jax.random.normal(k, shape, jnp.float32) / jnp.sqrt(jnp.float32(fan_in))

    params = {
        "wq": init(ks[0], (D, H * d_k), D),
        "wk": init(ks[1], (D, H * d_k), D),
        "wv": init(ks[2], (D, H * d_v), D),
        "wo": init(ks[3], (H * d_v, D), H * d_v),
        "w1": init(ks[4], (D, d_hid), D),
        "b1": 0.01 * jax.random.normal(ks[5], (1, d_hid), jnp.float32),
        "w2": init(ks[6], (d_hid, D), d_hid),
        "b2": 0.01 * jax.random.normal(ks[7], (1, D), jnp.float32),
        "g1": 1.0 + 0.1 * jax.random.normal(ks[8], (1, D), jnp.float32),
        "be1": 0.1 * jax.random.normal(ks[9], (1, D), jnp.float32),
        "g2": 1.0 + 0.1 * jax.random.normal(ks[10], (1, D), jnp.float32),
        "be2": 0.1 * jax.random.normal(ks[11], (1, D), jnp.float32),
    }

    x = jax.random.normal(ks[12], (B, L, D), jnp.float32)
    # Padding-style mask: batch 0 keeps all positions, batch 1 masks the last 3 keys.
    valid = jnp.array([L, L - 3])
    key_mask = (jnp.arange(L)[None, :] < valid[:, None]).astype(jnp.int32)       # (B, L)
    slf_attn_mask = jnp.broadcast_to(key_mask[:, None, :], (B, L, L)).astype(jnp.int32)

    ref = reference(x, slf_attn_mask, params, n_head=H, d_k=d_k, d_v=d_v)

    # f32 MXU path (tight check)
    out_f32 = jax.block_until_ready(
        encoder_layer(x, slf_attn_mask, params, n_head=H, d_k=d_k, d_v=d_v,
                      compute_dtype=jnp.float32))
    assert out_f32.shape == (B, L, D)
    assert jnp.allclose(out_f32, ref, atol=2e-3, rtol=2e-3), "f32 kernel mismatch"

    # bf16 MXU operands, f32 accumulation / softmax / LayerNorm (looser check)
    out_bf16 = jax.block_until_ready(
        encoder_layer(x, slf_attn_mask, params, n_head=H, d_k=d_k, d_v=d_v,
                      compute_dtype=jnp.bfloat16))
    assert jnp.allclose(out_bf16, ref, atol=1e-1, rtol=1e-1), "bf16 kernel mismatch"

    print("KERNEL_OK")
</pallas_src>

<mosaic_0001>
module attributes {stable_mosaic.version = 11 : i64} {
  func.func @encoder_layer_kernel(%arg0: i32, %arg1: i32, %arg2: i32, %arg3: memref<1x8x32xf32, #tpu.memory_space<vmem>>, %arg4: memref<1x8x32xf32, #tpu.memory_space<vmem>>, %arg5: memref<1x1x8xi32, #tpu.memory_space<vmem>>, %arg6: memref<32x32xf32, #tpu.memory_space<vmem>>, %arg7: memref<32x64xf32, #tpu.memory_space<vmem>>, %arg8: memref<32x32xf32, #tpu.memory_space<vmem>>, %arg9: memref<32x64xf32, #tpu.memory_space<vmem>>, %arg10: memref<1x64xf32, #tpu.memory_space<vmem>>, %arg11: memref<64x32xf32, #tpu.memory_space<vmem>>, %arg12: memref<1x32xf32, #tpu.memory_space<vmem>>, %arg13: memref<1x32xf32, #tpu.memory_space<vmem>>, %arg14: memref<1x32xf32, #tpu.memory_space<vmem>>, %arg15: memref<1x32xf32, #tpu.memory_space<vmem>>, %arg16: memref<1x32xf32, #tpu.memory_space<vmem>>, %arg17: memref<1x8x32xf32, #tpu.memory_space<vmem>>, %arg18: memref<4x8x1xf32, #tpu.memory_space<vmem>>, %arg19: memref<4x8x1xf32, #tpu.memory_space<vmem>>, %arg20: memref<4x8x8xf32, #tpu.memory_space<vmem>>) attributes {dimension_semantics = [#tpu.dimension_semantics<parallel>, #tpu.dimension_semantics<parallel>, #tpu.dimension_semantics<arbitrary>], iteration_bounds = array<i64: 2, 1, 1>, scalar_prefetch = 0 : i64, scratch_operands = 3 : i64, tpu.core_type = #tpu.core_type<tc>, window_params = [{transform_indices = @transform_0, window_bounds = array<i64: 1, 8, 32>}, {transform_indices = @transform_1, window_bounds = array<i64: 1, 8, 32>}, {transform_indices = @transform_2, window_bounds = array<i64: 1, 1, 8>}, {pipeline_mode = #tpu.pipeline_mode<synchronous>, transform_indices = @transform_3, window_bounds = array<i64: 32, 32>}, {pipeline_mode = #tpu.pipeline_mode<synchronous>, transform_indices = @transform_4, window_bounds = array<i64: 32, 64>}, {pipeline_mode = #tpu.pipeline_mode<synchronous>, transform_indices = @transform_5, window_bounds = array<i64: 32, 32>}, {pipeline_mode = #tpu.pipeline_mode<synchronous>, transform_indices = @transform_6, window_bounds = array<i64: 32, 64>}, {pipeline_mode = #tpu.pipeline_mode<synchronous>, transform_indices = @transform_7, window_bounds = array<i64: 1, 64>}, {pipeline_mode = #tpu.pipeline_mode<synchronous>, transform_indices = @transform_8, window_bounds = array<i64: 64, 32>}, {pipeline_mode = #tpu.pipeline_mode<synchronous>, transform_indices = @transform_9, window_bounds = array<i64: 1, 32>}, {pipeline_mode = #tpu.pipeline_mode<synchronous>, transform_indices = @transform_10, window_bounds = array<i64: 1, 32>}, {pipeline_mode = #tpu.pipeline_mode<synchronous>, transform_indices = @transform_11, window_bounds = array<i64: 1, 32>}, {pipeline_mode = #tpu.pipeline_mode<synchronous>, transform_indices = @transform_12, window_bounds = array<i64: 1, 32>}, {pipeline_mode = #tpu.pipeline_mode<synchronous>, transform_indices = @transform_13, window_bounds = array<i64: 1, 32>}, {transform_indices = @transform_14, window_bounds = array<i64: 1, 8, 32>}]} {
    %c0_i32 = arith.constant 0 : i32
    %0 = arith.cmpi eq, %arg2, %c0_i32 : i32
    %1 = arith.extui %0 : i1 to i32
    %c0_i32_0 = arith.constant 0 : i32
    %2 = arith.cmpi ne, %1, %c0_i32_0 : i32
    scf.if %2 {
      %cst_108 = arith.constant 0xFF800000 : f32
      %177 = vector.broadcast %cst_108 : f32 to vector<4x8x1xf32>
      %c0_109 = arith.constant 0 : index
      %c0_110 = arith.constant 0 : index
      %c0_111 = arith.constant 0 : index
      %178 = vector.load %arg18[%c0_109, %c0_110, %c0_111] : memref<4x8x1xf32, #tpu.memory_space<vmem>>, vector<4x8x1xf32>
      tpu.vector_store %arg18[%c0_109, %c0_110, %c0_111], %177 {strides = array<i32>} : memref<4x8x1xf32, #tpu.memory_space<vmem>>, vector<4x8x1xf32>,
      %cst_112 = arith.constant 0.000000e+00 : f32
      %179 = vector.broadcast %cst_112 : f32 to vector<4x8x1xf32>
      %c0_113 = arith.constant 0 : index
      %c0_114 = arith.constant 0 : index
      %c0_115 = arith.constant 0 : index
      %180 = vector.load %arg19[%c0_113, %c0_114, %c0_115] : memref<4x8x1xf32, #tpu.memory_space<vmem>>, vector<4x8x1xf32>
      tpu.vector_store %arg19[%c0_113, %c0_114, %c0_115], %179 {strides = array<i32>} : memref<4x8x1xf32, #tpu.memory_space<vmem>>, vector<4x8x1xf32>,
      %cst_116 = arith.constant 0.000000e+00 : f32
      %181 = vector.broadcast %cst_116 : f32 to vector<4x8x8xf32>
      %c0_117 = arith.constant 0 : index
      %c0_118 = arith.constant 0 : index
      %c0_119 = arith.constant 0 : index
      %182 = vector.load %arg20[%c0_117, %c0_118, %c0_119] : memref<4x8x8xf32, #tpu.memory_space<vmem>>, vector<4x8x8xf32>
      tpu.vector_store %arg20[%c0_117, %c0_118, %c0_119], %181 {strides = array<i32>} : memref<4x8x8xf32, #tpu.memory_space<vmem>>, vector<4x8x8xf32>,
    } else {
    }
    %c0 = arith.constant 0 : index
    %c0_1 = arith.constant 0 : index
    %c0_2 = arith.constant 0 : index
    %3 = vector.load %arg3[%c0, %c0_1, %c0_2] : memref<1x8x32xf32, #tpu.memory_space<vmem>>, vector<1x8x32xf32>
    %4 = vector.shape_cast %3 : vector<1x8x32xf32> to vector<8x32xf32>
    %c0_3 = arith.constant 0 : index
    %c0_4 = arith.constant 0 : index
    %5 = vector.load %arg6[%c0_3, %c0_4] : memref<32x32xf32, #tpu.memory_space<vmem>>, vector<32x32xf32>
    %cst = arith.constant dense<0.000000e+00> : vector<8x32xf32>
    %6 = tpu.matmul %4, %5, %cst {dimension_numbers = #tpu.dot_dimension_numbers<[1], [0], [0], [1], [0, 0, 1, 1], [], []>} : vector<8x32xf32>, vector<32x32xf32>, vector<8x32xf32> -> vector<8x32xf32>
    %c0_5 = arith.constant 0 : index
    %c0_6 = arith.constant 0 : index
    %c0_7 = arith.constant 0 : index
    %7 = vector.load %arg4[%c0_5, %c0_6, %c0_7] : memref<1x8x32xf32, #tpu.memory_space<vmem>>, vector<1x8x32xf32>
    %8 = vector.shape_cast %7 : vector<1x8x32xf32> to vector<8x32xf32>
    %c0_8 = arith.constant 0 : index
    %c0_9 = arith.constant 0 : index
    %9 = vector.load %arg7[%c0_8, %c0_9] : memref<32x64xf32, #tpu.memory_space<vmem>>, vector<32x64xf32>
    %cst_10 = arith.constant dense<0.000000e+00> : vector<8x64xf32>
    %10 = tpu.matmul %8, %9, %cst_10 {dimension_numbers = #tpu.dot_dimension_numbers<[1], [0], [0], [1], [0, 0, 1, 1], [], []>} : vector<8x32xf32>, vector<32x64xf32>, vector<8x64xf32> -> vector<8x64xf32>
    %c0_11 = arith.constant 0 : index
    %c0_12 = arith.constant 0 : index
    %c0_13 = arith.constant 0 : index
    %11 = vector.load %arg5[%c0_11, %c0_12, %c0_13] : memref<1x1x8xi32, #tpu.memory_space<vmem>>, vector<1x1x8xi32>
    %12 = vector.shape_cast %11 : vector<1x1x8xi32> to vector<1x8xi32>
    %c0_i32_14 = arith.constant 0 : i32
    %13 = vector.broadcast %c0_i32_14 : i32 to vector<1x8xi32>
    %14 = arith.cmpi eq, %12, %13 : vector<1x8xi32>
    %cst_15 = arith.constant -1.000000e+09 : f32
    %cst_16 = arith.constant 0.000000e+00 : f32
    %15 = vector.broadcast %cst_15 : f32 to vector<1x8xf32>
    %16 = vector.broadcast %cst_16 : f32 to vector<1x8xf32>
    %17 = arith.select %14, %15, %16 : vector<1x8xi1>, vector<1x8xf32>
    %18 = vector.extract_strided_slice %6 {offsets = [0, 0], sizes = [8, 8], strides = [1, 1]} : vector<8x32xf32> to vector<8x8xf32>
    %19 = vector.extract_strided_slice %10 {offsets = [0, 0], sizes = [8, 8], strides = [1, 1]} : vector<8x64xf32> to vector<8x8xf32>
    %20 = vector.extract_strided_slice %10 {offsets = [0, 32], sizes = [8, 8], strides = [1, 1]} : vector<8x64xf32> to vector<8x8xf32>
    %cst_17 = arith.constant dense<0.000000e+00> : vector<8x8xf32>
    %21 = tpu.matmul %18, %19, %cst_17 {dimension_numbers = #tpu.dot_dimension_numbers<[1], [1], [0], [0], [0, 0, 1, 0], [], []>} : vector<8x8xf32>, vector<8x8xf32>, vector<8x8xf32> -> vector<8x8xf32>
    %cst_18 = arith.constant 0.353553385 : f32
    %22 = vector.broadcast %cst_18 : f32 to vector<8x8xf32>
    %23 = arith.mulf %21, %22 : vector<8x8xf32>
    %24 = vector.broadcast %17 : vector<1x8xf32> to vector<8x8xf32>
    %25 = arith.addf %23, %24 : vector<8x8xf32>
    %c0_19 = arith.constant 0 : index
    %c0_20 = arith.constant 0 : index
    %c0_21 = arith.constant 0 : index
    %26 = vector.load %arg18[%c0_19, %c0_20, %c0_21] : memref<4x8x1xf32, #tpu.memory_space<vmem>>, vector<1x8x1xf32>
    %27 = vector.shape_cast %26 : vector<1x8x1xf32> to vector<8x1xf32>
    %cst_22 = arith.constant dense<0xFF800000> : vector<8xf32>
    %28 = vector.multi_reduction <maximumf>, %25, %cst_22 [1] : vector<8x8xf32> to vector<8xf32>
    %29 = vector.shape_cast %28 : vector<8xf32> to vector<8x1xf32>
    %30 = arith.maximumf %27, %29 : vector<8x1xf32>
    %31 = arith.subf %27, %30 : vector<8x1xf32>
    %32 = math.exp %31 : vector<8x1xf32>
    %33 = vector.broadcast %30 : vector<8x1xf32> to vector<8x8xf32>
    %34 = arith.subf %25, %33 : vector<8x8xf32>
    %35 = math.exp %34 : vector<8x8xf32>
    %c0_23 = arith.constant 0 : index
    %c0_24 = arith.constant 0 : index
    %c0_25 = arith.constant 0 : index
    %36 = vector.load %arg19[%c0_23, %c0_24, %c0_25] : memref<4x8x1xf32, #tpu.memory_space<vmem>>, vector<1x8x1xf32>
    %37 = vector.shape_cast %36 : vector<1x8x1xf32> to vector<8x1xf32>
    %38 = arith.mulf %32, %37 : vector<8x1xf32>
    %cst_26 = arith.constant dense<0.000000e+00> : vector<8xf32>
    %39 = vector.multi_reduction <add>, %35, %cst_26 [1] : vector<8x8xf32> to vector<8xf32>
    %40 = vector.shape_cast %39 : vector<8xf32> to vector<8x1xf32>
    %41 = arith.addf %38, %40 : vector<8x1xf32>
    %c0_27 = arith.constant 0 : index
    %c0_28 = arith.constant 0 : index
    %c0_29 = arith.constant 0 : index
    %42 = vector.load %arg19[%c0_27, %c0_28, %c0_29] : memref<4x8x1xf32, #tpu.memory_space<vmem>>, vector<1x8x1xf32>
    %43 = vector.shape_cast %42 : vector<1x8x1xf32> to vector<8x1xf32>
    %44 = vector.shape_cast %41 : vector<8x1xf32> to vector<1x8x1xf32>
    tpu.vector_store %arg19[%c0_27, %c0_28, %c0_29], %44 {strides = array<i32>} : memref<4x8x1xf32, #tpu.memory_space<vmem>>, vector<1x8x1xf32>,
    %c0_30 = arith.constant 0 : index
    %c0_31 = arith.constant 0 : index
    %c0_32 = arith.constant 0 : index
    %45 = vector.load %arg20[%c0_30, %c0_31, %c0_32] : memref<4x8x8xf32, #tpu.memory_space<vmem>>, vector<1x8x8xf32>
    %46 = vector.shape_cast %45 : vector<1x8x8xf32> to vector<8x8xf32>
    %47 = vector.broadcast %32 : vector<8x1xf32> to vector<8x8xf32>
    %48 = arith.mulf %47, %46 : vector<8x8xf32>
    %cst_33 = arith.constant dense<0.000000e+00> : vector<8x8xf32>
    %49 = tpu.matmul %35, %20, %cst_33 {dimension_numbers = #tpu.dot_dimension_numbers<[1], [0], [0], [1], [0, 0, 1, 1], [], []>} : vector<8x8xf32>, vector<8x8xf32>, vector<8x8xf32> -> vector<8x8xf32>
    %50 = arith.addf %48, %49 : vector<8x8xf32>
    %c0_34 = arith.constant 0 : index
    %c0_35 = arith.constant 0 : index
    %c0_36 = arith.constant 0 : index
    %51 = vector.load %arg20[%c0_34, %c0_35, %c0_36] : memref<4x8x8xf32, #tpu.memory_space<vmem>>, vector<1x8x8xf32>
    %52 = vector.shape_cast %51 : vector<1x8x8xf32> to vector<8x8xf32>
    %53 = vector.shape_cast %50 : vector<8x8xf32> to vector<1x8x8xf32>
    tpu.vector_store %arg20[%c0_34, %c0_35, %c0_36], %53 {strides = array<i32>} : memref<4x8x8xf32, #tpu.memory_space<vmem>>, vector<1x8x8xf32>,
    %c0_37 = arith.constant 0 : index
    %c0_38 = arith.constant 0 : index
    %c0_39 = arith.constant 0 : index
    %54 = vector.load %arg18[%c0_37, %c0_38, %c0_39] : memref<4x8x1xf32, #tpu.memory_space<vmem>>, vector<1x8x1xf32>
    %55 = vector.shape_cast %54 : vector<1x8x1xf32> to vector<8x1xf32>
    %56 = vector.shape_cast %30 : vector<8x1xf32> to vector<1x8x1xf32>
    tpu.vector_store %arg18[%c0_37, %c0_38, %c0_39], %56 {strides = array<i32>} : memref<4x8x1xf32, #tpu.memory_space<vmem>>, vector<1x8x1xf32>,
    %57 = vector.extract_strided_slice %6 {offsets = [0, 8], sizes = [8, 8], strides = [1, 1]} : vector<8x32xf32> to vector<8x8xf32>
    %58 = vector.extract_strided_slice %10 {offsets = [0, 8], sizes = [8, 8], strides = [1, 1]} : vector<8x64xf32> to vector<8x8xf32>
    %59 = vector.extract_strided_slice %10 {offsets = [0, 40], sizes = [8, 8], strides = [1, 1]} : vector<8x64xf32> to vector<8x8xf32>
    %cst_40 = arith.constant dense<0.000000e+00> : vector<8x8xf32>
    %60 = tpu.matmul %57, %58, %cst_40 {dimension_numbers = #tpu.dot_dimension_numbers<[1], [1], [0], [0], [0, 0, 1, 0], [], []>} : vector<8x8xf32>, vector<8x8xf32>, vector<8x8xf32> -> vector<8x8xf32>
    %cst_41 = arith.constant 0.353553385 : f32
    %61 = vector.broadcast %cst_41 : f32 to vector<8x8xf32>
    %62 = arith.mulf %60, %61 : vector<8x8xf32>
    %63 = vector.broadcast %17 : vector<1x8xf32> to vector<8x8xf32>
    %64 = arith.addf %62, %63 : vector<8x8xf32>
    %c1 = arith.constant 1 : index
    %c0_42 = arith.constant 0 : index
    %c0_43 = arith.constant 0 : index
    %65 = vector.load %arg18[%c1, %c0_42, %c0_43] : memref<4x8x1xf32, #tpu.memory_space<vmem>>, vector<1x8x1xf32>
    %66 = vector.shape_cast %65 : vector<1x8x1xf32> to vector<8x1xf32>
    %cst_44 = arith.constant dense<0xFF800000> : vector<8xf32>
    %67 = vector.multi_reduction <maximumf>, %64, %cst_44 [1] : vector<8x8xf32> to vector<8xf32>
    %68 = vector.shape_cast %67 : vector<8xf32> to vector<8x1xf32>
    %69 = arith.maximumf %66, %68 : vector<8x1xf32>
    %70 = arith.subf %66, %69 : vector<8x1xf32>
    %71 = math.exp %70 : vector<8x1xf32>
    %72 = vector.broadcast %69 : vector<8x1xf32> to vector<8x8xf32>
    %73 = arith.subf %64, %72 : vector<8x8xf32>
    %74 = math.exp %73 : vector<8x8xf32>
    %c1_45 = arith.constant 1 : index
    %c0_46 = arith.constant 0 : index
    %c0_47 = arith.constant 0 : index
    %75 = vector.load %arg19[%c1_45, %c0_46, %c0_47] : memref<4x8x1xf32, #tpu.memory_space<vmem>>, vector<1x8x1xf32>
    %76 = vector.shape_cast %75 : vector<1x8x1xf32> to vector<8x1xf32>
    %77 = arith.mulf %71, %76 : vector<8x1xf32>
    %cst_48 = arith.constant dense<0.000000e+00> : vector<8xf32>
    %78 = vector.multi_reduction <add>, %74, %cst_48 [1] : vector<8x8xf32> to vector<8xf32>
    %79 = vector.shape_cast %78 : vector<8xf32> to vector<8x1xf32>
    %80 = arith.addf %77, %79 : vector<8x1xf32>
    %c1_49 = arith.constant 1 : index
    %c0_50 = arith.constant 0 : index
    %c0_51 = arith.constant 0 : index
    %81 = vector.load %arg19[%c1_49, %c0_50, %c0_51] : memref<4x8x1xf32, #tpu.memory_space<vmem>>, vector<1x8x1xf32>
    %82 = vector.shape_cast %81 : vector<1x8x1xf32> to vector<8x1xf32>
    %83 = vector.shape_cast %80 : vector<8x1xf32> to vector<1x8x1xf32>
    tpu.vector_store %arg19[%c1_49, %c0_50, %c0_51], %83 {strides = array<i32>} : memref<4x8x1xf32, #tpu.memory_space<vmem>>, vector<1x8x1xf32>,
    %c1_52 = arith.constant 1 : index
    %c0_53 = arith.constant 0 : index
    %c0_54 = arith.constant 0 : index
    %84 = vector.load %arg20[%c1_52, %c0_53, %c0_54] : memref<4x8x8xf32, #tpu.memory_space<vmem>>, vector<1x8x8xf32>
    %85 = vector.shape_cast %84 : vector<1x8x8xf32> to vector<8x8xf32>
    %86 = vector.broadcast %71 : vector<8x1xf32> to vector<8x8xf32>
    %87 = arith.mulf %86, %85 : vector<8x8xf32>
    %cst_55 = arith.constant dense<0.000000e+00> : vector<8x8xf32>
    %88 = tpu.matmul %74, %59, %cst_55 {dimension_numbers = #tpu.dot_dimension_numbers<[1], [0], [0], [1], [0, 0, 1, 1], [], []>} : vector<8x8xf32>, vector<8x8xf32>, vector<8x8xf32> -> vector<8x8xf32>
    %89 = arith.addf %87, %88 : vector<8x8xf32>
    %c1_56 = arith.constant 1 : index
    %c0_57 = arith.constant 0 : index
    %c0_58 = arith.constant 0 : index
    %90 = vector.load %arg20[%c1_56, %c0_57, %c0_58] : memref<4x8x8xf32, #tpu.memory_space<vmem>>, vector<1x8x8xf32>
    %91 = vector.shape_cast %90 : vector<1x8x8xf32> to vector<8x8xf32>
    %92 = vector.shape_cast %89 : vector<8x8xf32> to vector<1x8x8xf32>
    tpu.vector_store %arg20[%c1_56, %c0_57, %c0_58], %92 {strides = array<i32>} : memref<4x8x8xf32, #tpu.memory_space<vmem>>, vector<1x8x8xf32>,
    %c1_59 = arith.constant 1 : index
    %c0_60 = arith.constant 0 : index
    %c0_61 = arith.constant 0 : index
    %93 = vector.load %arg18[%c1_59, %c0_60, %c0_61] : memref<4x8x1xf32, #tpu.memory_space<vmem>>, vector<1x8x1xf32>
    %94 = vector.shape_cast %93 : vector<1x8x1xf32> to vector<8x1xf32>
    %95 = vector.shape_cast %69 : vector<8x1xf32> to vector<1x8x1xf32>
    tpu.vector_store %arg18[%c1_59, %c0_60, %c0_61], %95 {strides = array<i32>} : memref<4x8x1xf32, #tpu.memory_space<vmem>>, vector<1x8x1xf32>,
    %96 = vector.extract_strided_slice %6 {offsets = [0, 16], sizes = [8, 8], strides = [1, 1]} : vector<8x32xf32> to vector<8x8xf32>
    %97 = vector.extract_strided_slice %10 {offsets = [0, 16], sizes = [8, 8], strides = [1, 1]} : vector<8x64xf32> to vector<8x8xf32>
    %98 = vector.extract_strided_slice %10 {offsets = [0, 48], sizes = [8, 8], strides = [1, 1]} : vector<8x64xf32> to vector<8x8xf32>
    %cst_62 = arith.constant dense<0.000000e+00> : vector<8x8xf32>
    %99 = tpu.matmul %96, %97, %cst_62 {dimension_numbers = #tpu.dot_dimension_numbers<[1], [1], [0], [0], [0, 0, 1, 0], [], []>} : vector<8x8xf32>, vector<8x8xf32>, vector<8x8xf32> -> vector<8x8xf32>
    %cst_63 = arith.constant 0.353553385 : f32
    %100 = vector.broadcast %cst_63 : f32 to vector<8x8xf32>
    %101 = arith.mulf %99, %100 : vector<8x8xf32>
    %102 = vector.broadcast %17 : vector<1x8xf32> to vector<8x8xf32>
    %103 = arith.addf %101, %102 : vector<8x8xf32>
    %c2 = arith.constant 2 : index
    %c0_64 = arith.constant 0 : index
    %c0_65 = arith.constant 0 : index
    %104 = vector.load %arg18[%c2, %c0_64, %c0_65] : memref<4x8x1xf32, #tpu.memory_space<vmem>>, vector<1x8x1xf32>
    %105 = vector.shape_cast %104 : vector<1x8x1xf32> to vector<8x1xf32>
    %cst_66 = arith.constant dense<0xFF800000> : vector<8xf32>
    %106 = vector.multi_reduction <maximumf>, %103, %cst_66 [1] : vector<8x8xf32> to vector<8xf32>
    %107 = vector.shape_cast %106 : vector<8xf32> to vector<8x1xf32>
    %108 = arith.maximumf %105, %107 : vector<8x1xf32>
    %109 = arith.subf %105, %108 : vector<8x1xf32>
    %110 = math.exp %109 : vector<8x1xf32>
    %111 = vector.broadcast %108 : vector<8x1xf32> to vector<8x8xf32>
    %112 = arith.subf %103, %111 : vector<8x8xf32>
    %113 = math.exp %112 : vector<8x8xf32>
    %c2_67 = arith.constant 2 : index
    %c0_68 = arith.constant 0 : index
    %c0_69 = arith.constant 0 : index
    %114 = vector.load %arg19[%c2_67, %c0_68, %c0_69] : memref<4x8x1xf32, #tpu.memory_space<vmem>>, vector<1x8x1xf32>
    %115 = vector.shape_cast %114 : vector<1x8x1xf32> to vector<8x1xf32>
    %116 = arith.mulf %110, %115 : vector<8x1xf32>
    %cst_70 = arith.constant dense<0.000000e+00> : vector<8xf32>
    %117 = vector.multi_reduction <add>, %113, %cst_70 [1] : vector<8x8xf32> to vector<8xf32>
    %118 = vector.shape_cast %117 : vector<8xf32> to vector<8x1xf32>
    %119 = arith.addf %116, %118 : vector<8x1xf32>
    %c2_71 = arith.constant 2 : index
    %c0_72 = arith.constant 0 : index
    %c0_73 = arith.constant 0 : index
    %120 = vector.load %arg19[%c2_71, %c0_72, %c0_73] : memref<4x8x1xf32, #tpu.memory_space<vmem>>, vector<1x8x1xf32>
    %121 = vector.shape_cast %120 : vector<1x8x1xf32> to vector<8x1xf32>
    %122 = vector.shape_cast %119 : vector<8x1xf32> to vector<1x8x1xf32>
    tpu.vector_store %arg19[%c2_71, %c0_72, %c0_73], %122 {strides = array<i32>} : memref<4x8x1xf32, #tpu.memory_space<vmem>>, vector<1x8x1xf32>,
    %c2_74 = arith.constant 2 : index
    %c0_75 = arith.constant 0 : index
    %c0_76 = arith.constant 0 : index
    %123 = vector.load %arg20[%c2_74, %c0_75, %c0_76] : memref<4x8x8xf32, #tpu.memory_space<vmem>>, vector<1x8x8xf32>
    %124 = vector.shape_cast %123 : vector<1x8x8xf32> to vector<8x8xf32>
    %125 = vector.broadcast %110 : vector<8x1xf32> to vector<8x8xf32>
    %126 = arith.mulf %125, %124 : vector<8x8xf32>
    %cst_77 = arith.constant dense<0.000000e+00> : vector<8x8xf32>
    %127 = tpu.matmul %113, %98, %cst_77 {dimension_numbers = #tpu.dot_dimension_numbers<[1], [0], [0], [1], [0, 0, 1, 1], [], []>} : vector<8x8xf32>, vector<8x8xf32>, vector<8x8xf32> -> vector<8x8xf32>
    %128 = arith.addf %126, %127 : vector<8x8xf32>
    %c2_78 = arith.constant 2 : index
    %c0_79 = arith.constant 0 : index
    %c0_80 = arith.constant 0 : index
    %129 = vector.load %arg20[%c2_78, %c0_79, %c0_80] : memref<4x8x8xf32, #tpu.memory_space<vmem>>, vector<1x8x8xf32>
    %130 = vector.shape_cast %129 : vector<1x8x8xf32> to vector<8x8xf32>
    %131 = vector.shape_cast %128 : vector<8x8xf32> to vector<1x8x8xf32>
    tpu.vector_store %arg20[%c2_78, %c0_79, %c0_80], %131 {strides = array<i32>} : memref<4x8x8xf32, #tpu.memory_space<vmem>>, vector<1x8x8xf32>,
    %c2_81 = arith.constant 2 : index
    %c0_82 = arith.constant 0 : index
    %c0_83 = arith.constant 0 : index
    %132 = vector.load %arg18[%c2_81, %c0_82, %c0_83] : memref<4x8x1xf32, #tpu.memory_space<vmem>>, vector<1x8x1xf32>
    %133 = vector.shape_cast %132 : vector<1x8x1xf32> to vector<8x1xf32>
    %134 = vector.shape_cast %108 : vector<8x1xf32> to vector<1x8x1xf32>
    tpu.vector_store %arg18[%c2_81, %c0_82, %c0_83], %134 {strides = array<i32>} : memref<4x8x1xf32, #tpu.memory_space<vmem>>, vector<1x8x1xf32>,
    %135 = vector.extract_strided_slice %6 {offsets = [0, 24], sizes = [8, 8], strides = [1, 1]} : vector<8x32xf32> to vector<8x8xf32>
    %136 = vector.extract_strided_slice %10 {offsets = [0, 24], sizes = [8, 8], strides = [1, 1]} : vector<8x64xf32> to vector<8x8xf32>
    %137 = vector.extract_strided_slice %10 {offsets = [0, 56], sizes = [8, 8], strides = [1, 1]} : vector<8x64xf32> to vector<8x8xf32>
    %cst_84 = arith.constant dense<0.000000e+00> : vector<8x8xf32>
    %138 = tpu.matmul %135, %136, %cst_84 {dimension_numbers = #tpu.dot_dimension_numbers<[1], [1], [0], [0], [0, 0, 1, 0], [], []>} : vector<8x8xf32>, vector<8x8xf32>, vector<8x8xf32> -> vector<8x8xf32>
    %cst_85 = arith.constant 0.353553385 : f32
    %139 = vector.broadcast %cst_85 : f32 to vector<8x8xf32>
    %140 = arith.mulf %138, %139 : vector<8x8xf32>
    %141 = vector.broadcast %17 : vector<1x8xf32> to vector<8x8xf32>
    %142 = arith.addf %140, %141 : vector<8x8xf32>
    %c3 = arith.constant 3 : index
    %c0_86 = arith.constant 0 : index
    %c0_87 = arith.constant 0 : index
    %143 = vector.load %arg18[%c3, %c0_86, %c0_87] : memref<4x8x1xf32, #tpu.memory_space<vmem>>, vector<1x8x1xf32>
    %144 = vector.shape_cast %143 : vector<1x8x1xf32> to vector<8x1xf32>
    %cst_88 = arith.constant dense<0xFF800000> : vector<8xf32>
    %145 = vector.multi_reduction <maximumf>, %142, %cst_88 [1] : vector<8x8xf32> to vector<8xf32>
    %146 = vector.shape_cast %145 : vector<8xf32> to vector<8x1xf32>
    %147 = arith.maximumf %144, %146 : vector<8x1xf32>
    %148 = arith.subf %144, %147 : vector<8x1xf32>
    %149 = math.exp %148 : vector<8x1xf32>
    %150 = vector.broadcast %147 : vector<8x1xf32> to vector<8x8xf32>
    %151 = arith.subf %142, %150 : vector<8x8xf32>
    %152 = math.exp %151 : vector<8x8xf32>
    %c3_89 = arith.constant 3 : index
    %c0_90 = arith.constant 0 : index
    %c0_91 = arith.constant 0 : index
    %153 = vector.load %arg19[%c3_89, %c0_90, %c0_91] : memref<4x8x1xf32, #tpu.memory_space<vmem>>, vector<1x8x1xf32>
    %154 = vector.shape_cast %153 : vector<1x8x1xf32> to vector<8x1xf32>
    %155 = arith.mulf %149, %154 : vector<8x1xf32>
    %cst_92 = arith.constant dense<0.000000e+00> : vector<8xf32>
    %156 = vector.multi_reduction <add>, %152, %cst_92 [1] : vector<8x8xf32> to vector<8xf32>
    %157 = vector.shape_cast %156 : vector<8xf32> to vector<8x1xf32>
    %158 = arith.addf %155, %157 : vector<8x1xf32>
    %c3_93 = arith.constant 3 : index
    %c0_94 = arith.constant 0 : index
    %c0_95 = arith.constant 0 : index
    %159 = vector.load %arg19[%c3_93, %c0_94, %c0_95] : memref<4x8x1xf32, #tpu.memory_space<vmem>>, vector<1x8x1xf32>
    %160 = vector.shape_cast %159 : vector<1x8x1xf32> to vector<8x1xf32>
    %161 = vector.shape_cast %158 : vector<8x1xf32> to vector<1x8x1xf32>
    tpu.vector_store %arg19[%c3_93, %c0_94, %c0_95], %161 {strides = array<i32>} : memref<4x8x1xf32, #tpu.memory_space<vmem>>, vector<1x8x1xf32>,
    %c3_96 = arith.constant 3 : index
    %c0_97 = arith.constant 0 : index
    %c0_98 = arith.constant 0 : index
    %162 = vector.load %arg20[%c3_96, %c0_97, %c0_98] : memref<4x8x8xf32, #tpu.memory_space<vmem>>, vector<1x8x8xf32>
    %163 = vector.shape_cast %162 : vector<1x8x8xf32> to vector<8x8xf32>
    %164 = vector.broadcast %149 : vector<8x1xf32> to vector<8x8xf32>
    %165 = arith.mulf %164, %163 : vector<8x8xf32>
    %cst_99 = arith.constant dense<0.000000e+00> : vector<8x8xf32>
    %166 = tpu.matmul %152, %137, %cst_99 {dimension_numbers = #tpu.dot_dimension_numbers<[1], [0], [0], [1], [0, 0, 1, 1], [], []>} : vector<8x8xf32>, vector<8x8xf32>, vector<8x8xf32> -> vector<8x8xf32>
    %167 = arith.addf %165, %166 : vector<8x8xf32>
    %c3_100 = arith.constant 3 : index
    %c0_101 = arith.constant 0 : index
    %c0_102 = arith.constant 0 : index
    %168 = vector.load %arg20[%c3_100, %c0_101, %c0_102] : memref<4x8x8xf32, #tpu.memory_space<vmem>>, vector<1x8x8xf32>
    %169 = vector.shape_cast %168 : vector<1x8x8xf32> to vector<8x8xf32>
    %170 = vector.shape_cast %167 : vector<8x8xf32> to vector<1x8x8xf32>
    tpu.vector_store %arg20[%c3_100, %c0_101, %c0_102], %170 {strides = array<i32>} : memref<4x8x8xf32, #tpu.memory_space<vmem>>, vector<1x8x8xf32>,
    %c3_103 = arith.constant 3 : index
    %c0_104 = arith.constant 0 : index
    %c0_105 = arith.constant 0 : index
    %171 = vector.load %arg18[%c3_103, %c0_104, %c0_105] : memref<4x8x1xf32, #tpu.memory_space<vmem>>, vector<1x8x1xf32>
    %172 = vector.shape_cast %171 : vector<1x8x1xf32> to vector<8x1xf32>
    %173 = vector.shape_cast %147 : vector<8x1xf32> to vector<1x8x1xf32>
    tpu.vector_store %arg18[%c3_103, %c0_104, %c0_105], %173 {strides = array<i32>} : memref<4x8x1xf32, #tpu.memory_space<vmem>>, vector<1x8x1xf32>,
    %c0_i32_106 = arith.constant 0 : i32
    %174 = arith.cmpi eq, %arg2, %c0_i32_106 : i32
    %175 = arith.extui %174 : i1 to i32
    %c0_i32_107 = arith.constant 0 : i32
    %176 = arith.cmpi ne, %175, %c0_i32_107 : i32
    scf.if %176 {
      %c0_108 = arith.constant 0 : index
      %c0_109 = arith.constant 0 : index
      %c0_110 = arith.constant 0 : index
      %177 = vector.load %arg3[%c0_108, %c0_109, %c0_110] : memref<1x8x32xf32, #tpu.memory_space<vmem>>, vector<1x8x32xf32>
      %178 = vector.shape_cast %177 : vector<1x8x32xf32> to vector<8x32xf32>
      %cst_111 = arith.constant 0.000000e+00 : f32
      %179 = vector.broadcast %cst_111 : f32 to vector<8x32xf32>
      %c0_112 = arith.constant 0 : index
      %c0_113 = arith.constant 0 : index
      %c0_114 = arith.constant 0 : index
      %180 = vector.load %arg19[%c0_112, %c0_113, %c0_114] : memref<4x8x1xf32, #tpu.memory_space<vmem>>, vector<1x8x1xf32>
      %181 = vector.shape_cast %180 : vector<1x8x1xf32> to vector<8x1xf32>
      %182 = tpu.reciprocal %181 {approx = true} : vector<8x1xf32> -> vector<8x1xf32>
      %c0_115 = arith.constant 0 : index
      %c0_116 = arith.constant 0 : index
      %c0_117 = arith.constant 0 : index
      %183 = vector.load %arg20[%c0_115, %c0_116, %c0_117] : memref<4x8x8xf32, #tpu.memory_space<vmem>>, vector<1x8x8xf32>
      %184 = vector.shape_cast %183 : vector<1x8x8xf32> to vector<8x8xf32>
      %185 = vector.broadcast %182 : vector<8x1xf32> to vector<8x8xf32>
      %186 = arith.mulf %184, %185 : vector<8x8xf32>
      %c0_118 = arith.constant 0 : index
      %c0_119 = arith.constant 0 : index
      %187 = vector.load %arg8[%c0_118, %c0_119] : memref<32x32xf32, #tpu.memory_space<vmem>>, vector<8x32xf32>
      %cst_120 = arith.constant dense<0.000000e+00> : vector<8x32xf32>
      %188 = tpu.matmul %186, %187, %cst_120 {dimension_numbers = #tpu.dot_dimension_numbers<[1], [0], [0], [1], [0, 0, 1, 1], [], []>} : vector<8x8xf32>, vector<8x32xf32>, vector<8x32xf32> -> vector<8x32xf32>
      %189 = arith.addf %179, %188 : vector<8x32xf32>
      %c1_121 = arith.constant 1 : index
      %c0_122 = arith.constant 0 : index
      %c0_123 = arith.constant 0 : index
      %190 = vector.load %arg19[%c1_121, %c0_122, %c0_123] : memref<4x8x1xf32, #tpu.memory_space<vmem>>, vector<1x8x1xf32>
      %191 = vector.shape_cast %190 : vector<1x8x1xf32> to vector<8x1xf32>
      %192 = tpu.reciprocal %191 {approx = true} : vector<8x1xf32> -> vector<8x1xf32>
      %c1_124 = arith.constant 1 : index
      %c0_125 = arith.constant 0 : index
      %c0_126 = arith.constant 0 : index
      %193 = vector.load %arg20[%c1_124, %c0_125, %c0_126] : memref<4x8x8xf32, #tpu.memory_space<vmem>>, vector<1x8x8xf32>
      %194 = vector.shape_cast %193 : vector<1x8x8xf32> to vector<8x8xf32>
      %195 = vector.broadcast %192 : vector<8x1xf32> to vector<8x8xf32>
      %196 = arith.mulf %194, %195 : vector<8x8xf32>
      %c8 = arith.constant 8 : index
      %c0_127 = arith.constant 0 : index
      %197 = vector.load %arg8[%c8, %c0_127] : memref<32x32xf32, #tpu.memory_space<vmem>>, vector<8x32xf32>
      %cst_128 = arith.constant dense<0.000000e+00> : vector<8x32xf32>
      %198 = tpu.matmul %196, %197, %cst_128 {dimension_numbers = #tpu.dot_dimension_numbers<[1], [0], [0], [1], [0, 0, 1, 1], [], []>} : vector<8x8xf32>, vector<8x32xf32>, vector<8x32xf32> -> vector<8x32xf32>
      %199 = arith.addf %189, %198 : vector<8x32xf32>
      %c2_129 = arith.constant 2 : index
      %c0_130 = arith.constant 0 : index
      %c0_131 = arith.constant 0 : index
      %200 = vector.load %arg19[%c2_129, %c0_130, %c0_131] : memref<4x8x1xf32, #tpu.memory_space<vmem>>, vector<1x8x1xf32>
      %201 = vector.shape_cast %200 : vector<1x8x1xf32> to vector<8x1xf32>
      %202 = tpu.reciprocal %201 {approx = true} : vector<8x1xf32> -> vector<8x1xf32>
      %c2_132 = arith.constant 2 : index
      %c0_133 = arith.constant 0 : index
      %c0_134 = arith.constant 0 : index
      %203 = vector.load %arg20[%c2_132, %c0_133, %c0_134] : memref<4x8x8xf32, #tpu.memory_space<vmem>>, vector<1x8x8xf32>
      %204 = vector.shape_cast %203 : vector<1x8x8xf32> to vector<8x8xf32>
      %205 = vector.broadcast %202 : vector<8x1xf32> to vector<8x8xf32>
      %206 = arith.mulf %204, %205 : vector<8x8xf32>
      %c16 = arith.constant 16 : index
      %c0_135 = arith.constant 0 : index
      %207 = vector.load %arg8[%c16, %c0_135] : memref<32x32xf32, #tpu.memory_space<vmem>>, vector<8x32xf32>
      %cst_136 = arith.constant dense<0.000000e+00> : vector<8x32xf32>
      %208 = tpu.matmul %206, %207, %cst_136 {dimension_numbers = #tpu.dot_dimension_numbers<[1], [0], [0], [1], [0, 0, 1, 1], [], []>} : vector<8x8xf32>, vector<8x32xf32>, vector<8x32xf32> -> vector<8x32xf32>
      %209 = arith.addf %199, %208 : vector<8x32xf32>
      %c3_137 = arith.constant 3 : index
      %c0_138 = arith.constant 0 : index
      %c0_139 = arith.constant 0 : index
      %210 = vector.load %arg19[%c3_137, %c0_138, %c0_139] : memref<4x8x1xf32, #tpu.memory_space<vmem>>, vector<1x8x1xf32>
      %211 = vector.shape_cast %210 : vector<1x8x1xf32> to vector<8x1xf32>
      %212 = tpu.reciprocal %211 {approx = true} : vector<8x1xf32> -> vector<8x1xf32>
      %c3_140 = arith.constant 3 : index
      %c0_141 = arith.constant 0 : index
      %c0_142 = arith.constant 0 : index
      %213 = vector.load %arg20[%c3_140, %c0_141, %c0_142] : memref<4x8x8xf32, #tpu.memory_space<vmem>>, vector<1x8x8xf32>
      %214 = vector.shape_cast %213 : vector<1x8x8xf32> to vector<8x8xf32>
      %215 = vector.broadcast %212 : vector<8x1xf32> to vector<8x8xf32>
      %216 = arith.mulf %214, %215 : vector<8x8xf32>
      %c24 = arith.constant 24 : index
      %c0_143 = arith.constant 0 : index
      %217 = vector.load %arg8[%c24, %c0_143] : memref<32x32xf32, #tpu.memory_space<vmem>>, vector<8x32xf32>
      %cst_144 = arith.constant dense<0.000000e+00> : vector<8x32xf32>
      %218 = tpu.matmul %216, %217, %cst_144 {dimension_numbers = #tpu.dot_dimension_numbers<[1], [0], [0], [1], [0, 0, 1, 1], [], []>} : vector<8x8xf32>, vector<8x32xf32>, vector<8x32xf32> -> vector<8x32xf32>
      %219 = arith.addf %209, %218 : vector<8x32xf32>
      %220 = arith.addf %219, %178 : vector<8x32xf32>
      %c0_145 = arith.constant 0 : index
      %c0_146 = arith.constant 0 : index
      %221 = vector.load %arg13[%c0_145, %c0_146] : memref<1x32xf32, #tpu.memory_space<vmem>>, vector<1x32xf32>
      %c0_147 = arith.constant 0 : index
      %c0_148 = arith.constant 0 : index
      %222 = vector.load %arg14[%c0_147, %c0_148] : memref<1x32xf32, #tpu.memory_space<vmem>>, vector<1x32xf32>
      %cst_149 = arith.constant dense<0.000000e+00> : vector<8xf32>
      %223 = vector.multi_reduction <add>, %220, %cst_149 [1] : vector<8x32xf32> to vector<8xf32>
      %224 = vector.shape_cast %223 : vector<8xf32> to vector<8x1xf32>
      %cst_150 = arith.constant 3.200000e+01 : f32
      %225 = vector.broadcast %cst_150 : f32 to vector<8x1xf32>
      %226 = arith.divf %224, %225 : vector<8x1xf32>
      %227 = vector.broadcast %226 : vector<8x1xf32> to vector<8x32xf32>
      %228 = arith.subf %220, %227 : vector<8x32xf32>
      %229 = arith.mulf %228, %228 : vector<8x32xf32>
      %cst_151 = arith.constant dense<0.000000e+00> : vector<8xf32>
      %230 = vector.multi_reduction <add>, %229, %cst_151 [1] : vector<8x32xf32> to vector<8xf32>
      %231 = vector.shape_cast %230 : vector<8xf32> to vector<8x1xf32>
      %cst_152 = arith.constant 3.200000e+01 : f32
      %232 = vector.broadcast %cst_152 : f32 to vector<8x1xf32>
      %233 = arith.divf %231, %232 : vector<8x1xf32>
      %234 = vector.broadcast %226 : vector<8x1xf32> to vector<8x32xf32>
      %235 = arith.subf %220, %234 : vector<8x32xf32>
      %cst_153 = arith.constant 9.99999997E-7 : f32
      %236 = vector.broadcast %cst_153 : f32 to vector<8x1xf32>
      %237 = arith.addf %233, %236 : vector<8x1xf32>
      %238 = math.rsqrt %237 : vector<8x1xf32>
      %239 = vector.broadcast %238 : vector<8x1xf32> to vector<8x32xf32>
      %240 = arith.mulf %235, %239 : vector<8x32xf32>
      %241 = vector.broadcast %221 : vector<1x32xf32> to vector<8x32xf32>
      %242 = arith.mulf %240, %241 : vector<8x32xf32>
      %243 = vector.broadcast %222 : vector<1x32xf32> to vector<8x32xf32>
      %244 = arith.addf %242, %243 : vector<8x32xf32>
      %c0_154 = arith.constant 0 : index
      %c0_155 = arith.constant 0 : index
      %245 = vector.load %arg9[%c0_154, %c0_155] : memref<32x64xf32, #tpu.memory_space<vmem>>, vector<32x64xf32>
      %cst_156 = arith.constant dense<0.000000e+00> : vector<8x64xf32>
      %246 = tpu.matmul %244, %245, %cst_156 {dimension_numbers = #tpu.dot_dimension_numbers<[1], [0], [0], [1], [0, 0, 1, 1], [], []>} : vector<8x32xf32>, vector<32x64xf32>, vector<8x64xf32> -> vector<8x64xf32>
      %c0_157 = arith.constant 0 : index
      %c0_158 = arith.constant 0 : index
      %247 = vector.load %arg10[%c0_157, %c0_158] : memref<1x64xf32, #tpu.memory_space<vmem>>, vector<1x64xf32>
      %248 = vector.broadcast %247 : vector<1x64xf32> to vector<8x64xf32>
      %249 = arith.addf %246, %248 : vector<8x64xf32>
      %cst_159 = arith.constant 0.000000e+00 : f32
      %250 = vector.broadcast %cst_159 : f32 to vector<8x64xf32>
      %251 = arith.maximumf %249, %250 : vector<8x64xf32>
      %c0_160 = arith.constant 0 : index
      %c0_161 = arith.constant 0 : index
      %252 = vector.load %arg11[%c0_160, %c0_161] : memref<64x32xf32, #tpu.memory_space<vmem>>, vector<64x32xf32>
      %cst_162 = arith.constant dense<0.000000e+00> : vector<8x32xf32>
      %253 = tpu.matmul %251, %252, %cst_162 {dimension_numbers = #tpu.dot_dimension_numbers<[1], [0], [0], [1], [0, 0, 1, 1], [], []>} : vector<8x64xf32>, vector<64x32xf32>, vector<8x32xf32> -> vector<8x32xf32>
      %c0_163 = arith.constant 0 : index
      %c0_164 = arith.constant 0 : index
      %254 = vector.load %arg12[%c0_163, %c0_164] : memref<1x32xf32, #tpu.memory_space<vmem>>, vector<1x32xf32>
      %255 = vector.broadcast %254 : vector<1x32xf32> to vector<8x32xf32>
      %256 = arith.addf %253, %255 : vector<8x32xf32>
      %257 = arith.addf %256, %244 : vector<8x32xf32>
      %c0_165 = arith.constant 0 : index
      %c0_166 = arith.constant 0 : index
      %258 = vector.load %arg15[%c0_165, %c0_166] : memref<1x32xf32, #tpu.memory_space<vmem>>, vector<1x32xf32>
      %c0_167 = arith.constant 0 : index
      %c0_168 = arith.constant 0 : index
      %259 = vector.load %arg16[%c0_167, %c0_168] : memref<1x32xf32, #tpu.memory_space<vmem>>, vector<1x32xf32>
      %cst_169 = arith.constant dense<0.000000e+00> : vector<8xf32>
      %260 = vector.multi_reduction <add>, %257, %cst_169 [1] : vector<8x32xf32> to vector<8xf32>
      %261 = vector.shape_cast %260 : vector<8xf32> to vector<8x1xf32>
      %cst_170 = arith.constant 3.200000e+01 : f32
      %262 = vector.broadcast %cst_170 : f32 to vector<8x1xf32>
      %263 = arith.divf %261, %262 : vector<8x1xf32>
      %264 = vector.broadcast %263 : vector<8x1xf32> to vector<8x32xf32>
      %265 = arith.subf %257, %264 : vector<8x32xf32>
      %266 = arith.mulf %265, %265 : vector<8x32xf32>
      %cst_171 = arith.constant dense<0.000000e+00> : vector<8xf32>
      %267 = vector.multi_reduction <add>, %266, %cst_171 [1] : vector<8x32xf32> to vector<8xf32>
      %268 = vector.shape_cast %267 : vector<8xf32> to vector<8x1xf32>
      %cst_172 = arith.constant 3.200000e+01 : f32
      %269 = vector.broadcast %cst_172 : f32 to vector<8x1xf32>
      %270 = arith.divf %268, %269 : vector<8x1xf32>
      %271 = vector.broadcast %263 : vector<8x1xf32> to vector<8x32xf32>
      %272 = arith.subf %257, %271 : vector<8x32xf32>
      %cst_173 = arith.constant 9.99999997E-7 : f32
      %273 = vector.broadcast %cst_173 : f32 to vector<8x1xf32>
      %274 = arith.addf %270, %273 : vector<8x1xf32>
      %275 = math.rsqrt %274 : vector<8x1xf32>
      %276 = vector.broadcast %275 : vector<8x1xf32> to vector<8x32xf32>
      %277 = arith.mulf %272, %276 : vector<8x32xf32>
      %278 = vector.broadcast %258 : vector<1x32xf32> to vector<8x32xf32>
      %279 = arith.mulf %277, %278 : vector<8x32xf32>
      %280 = vector.broadcast %259 : vector<1x32xf32> to vector<8x32xf32>
      %281 = arith.addf %279, %280 : vector<8x32xf32>
      %c0_174 = arith.constant 0 : index
      %c0_175 = arith.constant 0 : index
      %c0_176 = arith.constant 0 : index
      %282 = vector.load %arg17[%c0_174, %c0_175, %c0_176] : memref<1x8x32xf32, #tpu.memory_space<vmem>>, vector<1x8x32xf32>
      %283 = vector.shape_cast %282 : vector<1x8x32xf32> to vector<8x32xf32>
      %284 = vector.shape_cast %281 : vector<8x32xf32> to vector<1x8x32xf32>
      tpu.vector_store %arg17[%c0_174, %c0_175, %c0_176], %284 {strides = array<i32>} : memref<1x8x32xf32, #tpu.memory_space<vmem>>, vector<1x8x32xf32>,
    } else {
    }
    return
  }
  func.func @transform_0(%arg0: i32, %arg1: i32, %arg2: i32) -> (i32, i32, i32) {
    %c0_i32 = arith.constant 0 : i32
    %c0_i32_0 = arith.constant 0 : i32
    return %arg0, %arg1, %c0_i32 : i32, i32, i32
  }
  func.func @transform_1(%arg0: i32, %arg1: i32, %arg2: i32) -> (i32, i32, i32) {
    %c0_i32 = arith.constant 0 : i32
    %c0_i32_0 = arith.constant 0 : i32
    return %arg0, %arg2, %c0_i32 : i32, i32, i32
  }
  func.func @transform_2(%arg0: i32, %arg1: i32, %arg2: i32) -> (i32, i32, i32) {
    %c0_i32 = arith.constant 0 : i32
    %c0_i32_0 = arith.constant 0 : i32
    return %arg0, %c0_i32, %arg2 : i32, i32, i32
  }
  func.func @transform_3(%arg0: i32, %arg1: i32, %arg2: i32) -> (i32, i32) {
    %c0_i32 = arith.constant 0 : i32
    %c0_i32_0 = arith.constant 0 : i32
    %c0_i32_1 = arith.constant 0 : i32
    return %c0_i32, %c0_i32_0 : i32, i32
  }
  func.func @transform_4(%arg0: i32, %arg1: i32, %arg2: i32) -> (i32, i32) {
    %c0_i32 = arith.constant 0 : i32
    %c0_i32_0 = arith.constant 0 : i32
    %c0_i32_1 = arith.constant 0 : i32
    return %c0_i32, %c0_i32_0 : i32, i32
  }
  func.func @transform_5(%arg0: i32, %arg1: i32, %arg2: i32) -> (i32, i32) {
    %c0_i32 = arith.constant 0 : i32
    %c0_i32_0 = arith.constant 0 : i32
    %c0_i32_1 = arith.constant 0 : i32
    return %c0_i32, %c0_i32_0 : i32, i32
  }
  func.func @transform_6(%arg0: i32, %arg1: i32, %arg2: i32) -> (i32, i32) {
    %c0_i32 = arith.constant 0 : i32
    %c0_i32_0 = arith.constant 0 : i32
    %c0_i32_1 = arith.constant 0 : i32
    return %c0_i32, %c0_i32_0 : i32, i32
  }
  func.func @transform_7(%arg0: i32, %arg1: i32, %arg2: i32) -> (i32, i32) {
    %c0_i32 = arith.constant 0 : i32
    %c0_i32_0 = arith.constant 0 : i32
    %c0_i32_1 = arith.constant 0 : i32
    return %c0_i32, %c0_i32_0 : i32, i32
  }
  func.func @transform_8(%arg0: i32, %arg1: i32, %arg2: i32) -> (i32, i32) {
    %c0_i32 = arith.constant 0 : i32
    %c0_i32_0 = arith.constant 0 : i32
    %c0_i32_1 = arith.constant 0 : i32
    return %c0_i32, %c0_i32_0 : i32, i32
  }
  func.func @transform_9(%arg0: i32, %arg1: i32, %arg2: i32) -> (i32, i32) {
    %c0_i32 = arith.constant 0 : i32
    %c0_i32_0 = arith.constant 0 : i32
    %c0_i32_1 = arith.constant 0 : i32
    return %c0_i32, %c0_i32_0 : i32, i32
  }
  func.func @transform_10(%arg0: i32, %arg1: i32, %arg2: i32) -> (i32, i32) {
    %c0_i32 = arith.constant 0 : i32
    %c0_i32_0 = arith.constant 0 : i32
    %c0_i32_1 = arith.constant 0 : i32
    return %c0_i32, %c0_i32_0 : i32, i32
  }
  func.func @transform_11(%arg0: i32, %arg1: i32, %arg2: i32) -> (i32, i32) {
    %c0_i32 = arith.constant 0 : i32
    %c0_i32_0 = arith.constant 0 : i32
    %c0_i32_1 = arith.constant 0 : i32
    return %c0_i32, %c0_i32_0 : i32, i32
  }
  func.func @transform_12(%arg0: i32, %arg1: i32, %arg2: i32) -> (i32, i32) {
    %c0_i32 = arith.constant 0 : i32
    %c0_i32_0 = arith.constant 0 : i32
    %c0_i32_1 = arith.constant 0 : i32
    return %c0_i32, %c0_i32_0 : i32, i32
  }
  func.func @transform_13(%arg0: i32, %arg1: i32, %arg2: i32) -> (i32, i32) {
    %c0_i32 = arith.constant 0 : i32
    %c0_i32_0 = arith.constant 0 : i32
    %c0_i32_1 = arith.constant 0 : i32
    return %c0_i32, %c0_i32_0 : i32, i32
  }
  func.func @transform_14(%arg0: i32, %arg1: i32, %arg2: i32) -> (i32, i32, i32) {
    %c0_i32 = arith.constant 0 : i32
    %c0_i32_0 = arith.constant 0 : i32
    return %arg0, %arg1, %c0_i32 : i32, i32, i32
  }
}

</mosaic_0001>

<bundles_post_ra>
// kernel: tpu_custom_call.1
= control target key start
LH: loop header
LB: loop body
LE: loop exit
PB: predicated region body
PF: predicated region fallthrough
CT: control target
= control target key end

     0   :  { %s3276_s0 = inlined_call_operand.hbm [shape: f32[2,8,32], index: 0, kind: input, shape index: {}]   ;;  %s3277_s1 = inlined_call_operand.hbm [shape: f32[2,8,32], index: 1, kind: input, shape index: {}]   ;;  %s3278_s2 = inlined_call_operand.vmem [shape: s32[2,1,8], index: 2, kind: input, shape index: {}]   ;;  %s3279_s3 = inlined_call_operand.vmem [shape: f32[32,32], index: 3, kind: input, shape index: {}]   ;;  %s3280_s4 = inlined_call_operand.vmem [shape: f32[32,64], index: 4, kind: input, shape index: {}]   ;;  %s3281_s5 = inlined_call_operand.vmem [shape: f32[32,32], index: 5, kind: input, shape index: {}]   ;;  %s3282_s6 = inlined_call_operand.hbm [shape: f32[32,64], index: 6, kind: input, shape index: {}]   ;;  %s3283_s7 = inlined_call_operand.vmem [shape: f32[1,64], index: 7, kind: input, shape index: {}]   ;;  %s3284_s8 = inlined_call_operand.vmem [shape: f32[64,32], index: 8, kind: input, shape index: {}]   ;;  %s3285_s9 = inlined_call_operand.vmem [shape: f32[1,32], index: 9, kind: input, shape index: {}]   ;;  %s3286_s10 = inlined_call_operand.vmem [shape: f32[1,32], index: 10, kind: input, shape index: {}]   ;;  %s3287_s11 = inlined_call_operand.vmem [shape: f32[1,32], index: 11, kind: input, shape index: {}]   ;;  %s3288_s12 = inlined_call_operand.vmem [shape: f32[1,32], index: 12, kind: input, shape index: {}]   ;;  %s3289_s13 = inlined_call_operand.vmem [shape: f32[1,32], index: 13, kind: input, shape index: {}]   ;;  %s3290_s14 = inlined_call_operand.hbm [shape: f32[2,8,32], index: 14, kind: output, shape index: {}]  }
   0x1   :  { %3298 = sst [smem:[#allocation21_spill]] %s3282_s6 }
   0x2   :  { %3299 = sst [smem:[#allocation22_spill]] %s3283_s7 }
   0x3   :  { %3300 = sst [smem:[#allocation23_spill]] %s3285_s9 }
   0x4   :  { %3301 = sst [smem:[#allocation24_spill]] %s3287_s11 }
   0x5   :  { %3302 = sst [smem:[#allocation25_spill]] %s3288_s12 }
   0x6   :  { %3303 = sst [smem:[#allocation26_spill]] %s3289_s13 }
   0x7   :  { %3304 = sst [smem:[#allocation27_spill]] %s3290_s14 }
   0x8   :  { %19 = vsyncpa [#allocation6], 0 }
   0x9   :  { %21 = vsyncpa [#allocation6 + $0x1], 0 }
   0xa   :  { %22 = vsyncpa [#allocation9], 0 }
   0xb   :  { %24 = vsyncpa [#allocation9 + $0x1], 0 }
   0xc   :  { %25 = vsyncpa [#allocation7], 0 }
   0xd   :  { %27 = vsyncpa [#allocation7 + $0x1], 0  ;;  %s2841_s29 = smov 0   ;;  %s2843_s30 = smov 0  }
   0xe   :  { %s2845_s15 = smov 0   ;;  %s2847_s16 = smov 0  }
   0xf   :  { %s2849_s17 = smov 0   ;;  %s2851_s18 = smov 0  }
  0x10 LB: > { %3305 = sst [smem:[#allocation16_spill]] %s2727_s29  ;;  %s2872_s19 = sadd.s32 4294967295, %s2747_s18   ;;  %s2747_s18 = sphi %s2851_s18, %s33_s18   ;;  %s2743_s17 = sphi %s2849_s17, %s3331_s17   ;;  %s2739_s16 = sphi %s2847_s16, %s3330_s16   ;;  %s2735_s15 = sphi %s2845_s15, %s3334_s15   ;;  %s2731_s30 = sphi %s2843_s30, %s3333_s30   ;;  %s2727_s29 = sphi %s2841_s29, %s3332_s29  }
  0x11   : > { %3306 = sst [smem:[#allocation17_spill]] %s2743_s17  ;;  %s2253_s20 = sadd.s32 4294967294, %s2747_s18  }
  0x12   : > { %p74_p0 = scmp.ne.s32.totalorder %s2731_s30, %s2727_s29  ;;  %p75_p1 = scmp.eq.s32.totalorder %s2872_s19, 0 }
  0x13   : > { %p393_p3 = scmp.eq.s32.totalorder %s2253_s20, 1  ;;  %p2254_p5 = scmp.ge.s32.totalorder %s2747_s18, 1 }
  0x14   : > { %p2881_p4 = por %p75_p1, %p74_p0  ;;  %p400_p7 = scmp.lt.s32.totalorder %s2747_s18, 3 }
  0x15   : > { %p2886_p6 = por %p393_p3, %p74_p0  ;;  %s2749_s24 = smov [#allocation10]  }
  0x16   : > { %p2891_p8 = pnand %p2254_p5, %p400_p7  ;;  %s421_s25 = sshll.u32 %s2749_s24, 4  ;;  %s422_s25 = int_to_ptr.vmem [resolvable:$true] %s421_s25 }
  0x17   : > { %s3308_s22 = scalar_select %p2886_p6, 1, 0 }
  0x18   : > { %p2466_p9 = pneg %p2891_p8  ;;  %s52_s27 = sadd.s32 1, %s2743_s17 }
  0x19   : > { %3309 = sst [smem:[#allocation18_spill]] %s3308_s22  ;;  %s2588_s28 = scalar_lea.vmem %s422_s25, 512 }
  0x1a   : > { %p2900_p11 = pnand %p2466_p9, %p75_p1  ;;  %p2589_p13 = scmp.ne.s32.totalorder %s422_s25, %s2588_s28 }
  0x1b   : > { %p2596_p5 = scmp.lt.s32.totalorder %s422_s25, %s422_s25  ;;  %p2597_p7 = scmp.lt.s32.totalorder %s2588_s28, %s2588_s28 }
  0x1c   : > { %p2579_p12 = pneg %p2900_p11 }
  0x1d   : > { %p2598_p2 = por %p2597_p7, %p2596_p5 }
  0x1e   : > { %p2591_p0 = pnand %p2589_p13, %p2579_p12 }
  0x20   : > { %p2592_p3 = pneg %p2591_p0 }
  0x22   : > { %p2599_p6 = pnand %p2598_p2, %p2592_p3 }
  0x24   : > { %2602 = shalt.err (!%p2599_p6)
}
  0x25   : > { %s2750_s20 = smov 128   ;;  %s2751_s24 = smov 8  }
  0x26   : > { %s3312_s6 = sld [smem:[#allocation21_spill]]  ;;  %p54_p2 = scmp.ge.s32.totalorder %s52_s27, 2 }
  0x27   : > { %s61_s28 = sadd.s32 1, %s2735_s15  ;;  %p68_p6 = scmp.ne.s32.totalorder %s2735_s15, %s2731_s30 }
  0x28   : > { %p69_p9 = scmp.eq.s32.totalorder %s2747_s18, 0  ;;  %s3336_s27 = smov (%p54_p2, %s52_s27), 0 }
  0x29   : > { %3313 = sst [smem:[#allocation19_spill]] %s3336_s27  ;;  %p3315_p13 = scmp.eq.s32.totalorder %s2872_s19, 1 }
  0x2a   : > { %p2918_p12 = por %p69_p9, %p68_p6  ;;  %s56_s29 = ssub.s32 %s2743_s17, %s3336_s27 }
  0x2b   : > { %p2924_p0 = por %p3315_p13, %p68_p6  ;;  %p59_p3 = scmp.eq.s32.totalorder %s56_s29, 0 }
  0x2c   : > { %2469 = dma.hbm_to_vmem [thread:$0]  (!%p2900_p11), %s3312_s6, 512, %s422_s25, [#allocation9], %s2750_s20, %s2750_s20, %s2751_s24  }
  0x2d   : > { %s3316_s26 = scalar_select %p2924_p0, 1, 0 }
  0x2e   : > { %p2482_p11 = scmp.lt.s32.totalorder %s2747_s18, 2  ;;  %s456_s22 = sand.u32 1, %s2735_s15  }
  0x2f   : > { %3317 = sst [smem:[#allocation20_spill]] %s3316_s26  ;;  %s2257_s25 = sshll.u32 %s456_s22, 3 }
  0x30   : > { %s2933_s20 = scalar_select %p59_p3, %s2735_s15, %s61_s28  }
  0x31   : > { %s2258_s24 = sshll.u32 %s2743_s17, 7  ;;  %s460_s9 = scalar_lea.vmem [#allocation5], %s2257_s25 }
  0x32   : > { %s466_s12 = scalar_lea.hbm %s3276_s0, %s2258_s24  ;;  %s468_s7 = sshll.u32 %s460_s9, 4  ;;  %s469_s7 = int_to_ptr.vmem [resolvable:$true] %s468_s7 }
  0x33   : > { %p2941_p5 = pnand %p2482_p11, %p2918_p12  ;;  %s2948_s28 = scalar_lea.hbm %s3277_s1, %s2258_s24 }
  0x34   : > { %s475_s29 = sand.u32 1, %s2747_s18   ;;  %s457_s17 = scalar_lea.sflag [#allocation6], %s456_s22 }
  0x35   : > { %p2605_p7 = pneg %p2941_p5  ;;  %s2616_s6 = scalar_lea.vmem %s469_s7, 128 }
  0x36   : > { %p2617_p2 = scmp.ne.s32.totalorder %s469_s7, %s2616_s6  ;;  %s2752_s9 = smov [#allocation5]  }
  0x37   : > { %s2621_s13 = sshll.u32 %s2752_s9, 4  ;;  %s2622_s13 = int_to_ptr.vmem [resolvable:$false] %s2621_s13 }
  0x38   : > { %p2619_p6 = pnand %p2617_p2, %p2605_p7  ;;  %s2623_s14 = scalar_lea.vmem %s2622_s13, 256 }
  0x39   : > { %p2624_p12 = scmp.lt.s32.totalorder %s469_s7, %s2622_s13  ;;  %p2625_p13 = scmp.lt.s32.totalorder %s2623_s14, %s2616_s6 }
  0x3a   : > { %p2620_p9 = pneg %p2619_p6 }
  0x3b   : > { %p2626_p11 = por %p2625_p13, %p2624_p12 }
  0x3d   : > { %p2627_p3 = pnand %p2626_p11, %p2620_p9 }
  0x3f   : > { %2630 = shalt.err (!%p2627_p3)
}
  0x40   : > { %2473 = dma.hbm_to_vmem [thread:$0]  (!%p2941_p5), %s466_s12, 128, %s469_s7, %s457_s17  }
  0x41   : > { %s479_s27 = scalar_lea.vmem [#allocation8], %s2257_s25  ;;  %s476_s22 = scalar_lea.sflag [#allocation9], %s475_s29 }
  0x42   : > { %s487_s26 = sshll.u32 %s479_s27, 4  ;;  %s2753_s9 = smov [#allocation8]   ;;  %s488_s26 = int_to_ptr.vmem [resolvable:$true] %s487_s26 }
  0x43   : > { %s2644_s24 = scalar_lea.vmem %s488_s26, 128  ;;  %s2649_s13 = sshll.u32 %s2753_s9, 4  ;;  %s2650_s13 = int_to_ptr.vmem [resolvable:$false] %s2649_s13 }
  0x44   : > { %p2645_p2 = scmp.ne.s32.totalorder %s488_s26, %s2644_s24  ;;  %s2651_s6 = scalar_lea.vmem %s2650_s13, 256 }
  0x45   : > { %p2652_p9 = scmp.lt.s32.totalorder %s488_s26, %s2650_s13  ;;  %p2653_p12 = scmp.lt.s32.totalorder %s2651_s6, %s2644_s24 }
  0x46   : > { %p2647_p6 = pnand %p2645_p2, %p2605_p7 }
  0x47   : > { %p2654_p13 = por %p2653_p12, %p2652_p9 }
  0x48   : > { %p2648_p10 = pneg %p2647_p6 }
  0x4a   : > { %p2655_p11 = pnand %p2654_p13, %p2648_p10 }
  0x4c   : > { %2658 = shalt.err (!%p2655_p11)
}
  0x4d   : > { %2476 = dma.hbm_to_vmem [thread:$0]  (!%p2941_p5), %s2948_s28, 128, %s488_s26, %s476_s22  }
  0x4e   : > { %505 = sbr.rel (%p2891_p8) target bundleno = 2776 (0xad8), region = 76  ;;  %s2967_s7 = sand.u32 (!%p2891_p8), 1, %s2731_s30  }
  0x4f   : > { %s2970_s12 = sshll.u32 (!%p2891_p8), %s2967_s7, 3  ;;  %s508_s17 = scalar_lea.sflag (!%p2891_p8), [#allocation6], %s2967_s7 }
  0x50   : > { %s511_s25 = scalar_lea.vmem (!%p2891_p8), [#allocation5], %s2970_s12 }
  0x53   : > { %2710 = dma.done.wait (%p2881_p4), %s508_s17, 128  }
  0x54   : > { %2712 = vsyncadd (%p2881_p4), %s508_s17, 4294967168  ;;  %s516_s11 = sand.u32 1, %s2872_s19   ;;  %s520_s28 = scalar_lea.vmem [#allocation8], %s2970_s12 }
  0x55   : > { %s517_s23 = scalar_lea.sflag [#allocation9], %s516_s11 }
  0x56   : > { %2714 = dma.done.wait (%p2881_p4), %s517_s23, 128  }
  0x57   : > { %2716 = vsyncadd (%p2881_p4), %s517_s23, 4294967168 }
  0x58   : > { %2718 = dma.done.wait (%p75_p1), [#allocation9], 512  }
  0x59   : > { %2720 = vsyncadd (%p75_p1), [#allocation9], 4294966784  ;;  %v2754_v0 = vmov 0.0   ;;  %vm2755_vm0 = vmmov 0   ;;  %v687_v1 = vld [vmem:[%s3280_s4 + $0x18] sm:$0xff]  ;;  %v686_v3 = vld [vmem:[%s3280_s4 + $0x10] sm:$0xff]  ;;  %v843_v17 = vlaneseq }
  0x5a   : > { %2355 = vmatprep.subr.mxu1 %v2754_v0  ;;  %2344 = vmatprep.subr.mxu0 %v2754_v0  ;;  %v608_v2 = vld [vmem:[%s3279_s3 + $0x18] sm:$0xff]  ;;  %v607_v4 = vld [vmem:[%s3279_s3 + $0x10] sm:$0xff]  ;;  %v685_v5 = vld [vmem:[%s3280_s4 + $0x8] sm:$0xff]  ;;  %vm609_vm1 = vcmask 261120   ;;  %vm599_vm2 = vcmask 64512   ;;  %s2758_s14 = smov 112  }
  0x5b   : > { %2363 = vmatprep.mubr.msk.f32.mxu1 %vm2755_vm0, %v2754_v0  ;;  %2352 = vmatprep.mubr.msk.f32.mxu0 %vm2755_vm0, %v2754_v0  ;;  %v606_v6 = vld [vmem:[%s3279_s3 + $0x8] sm:$0xff]  ;;  %v684_v7 = vld [vmem:[%s3280_s4] sm:$0xff]  ;;  %v683_v9 = vld [vmem:[%s520_s28] sm:$0xff]  ;;  %600 = vst.msk [vmem:[#allocation4] sm:$0xff] %vm599_vm2, %v2754_v0  ;;  %s2757_s28 = smov 120   ;;  %s2759_s27 = smov 104  }
  0x5c   : > { %2356 = vmatpush3.msra.mxu1 %v687_v1  ;;  %2345 = vmatpush3.msra.mxu0 %v608_v2  ;;  %v605_v8 = vld [vmem:[%s3279_s3] sm:$0xff]  ;;  %601 = vst.msk [vmem:[#allocation4 + $0x8] sm:$0xff] %vm599_vm2, %v2754_v0  ;;  %602 = vst.msk [vmem:[#allocation4 + $0x10] sm:$0xff] %vm599_vm2, %v2754_v0  ;;  %vm590_vm3 = vcmask 7168   ;;  %v2760_v15 = vmov -inf   ;;  %p580_p1 = scmp.lt.s32.totalorder %s2739_s16, 1 }
  0x5d   : > { %2357 = vmatprep.subr.mxu1 %v2754_v0  ;;  %2346 = vmatprep.subr.mxu0 %v2754_v0  ;;  %v3024_v10 = vld [vmem:[%s511_s25] sm:$0xff]  ;;  %603 = vst.msk [vmem:[#allocation4 + $0x18] sm:$0xff] %vm599_vm2, %v2754_v0  ;;  %s2756_s25 = smov 96   ;;  %v844_v19 = vshrl.u32 %v843_v17, 7  ;;  %v2761_v28 = vmov 0   ;;  %s2762_s9 = smov 88  }
  0x5e   : > { %2358 = vmatpush3.msra.mxu1 %v686_v3  ;;  %2347 = vmatpush3.msra.mxu0 %v607_v4  ;;  %591 = vst.msk [vmem:[#allocation2] sm:$0xff] %vm590_vm3, %v2760_v15  ;;  %592 = vst.msk [vmem:[#allocation2 + $0x8] sm:$0xff] %vm590_vm3, %v2760_v15  ;;  %s581_s19 = scalar_select %p580_p1, %s2739_s16, 1  ;;  %vm2004_vm5 = vcmask 523264  }
  0x5f   : > { %2359 = vmatprep.subr.mxu1 %v2754_v0  ;;  %2348 = vmatprep.subr.mxu0 %v2754_v0  ;;  %593 = vst.msk [vmem:[#allocation2 + $0x10] sm:$0xff] %vm590_vm3, %v2760_v15  ;;  %594 = vst.msk [vmem:[#allocation2 + $0x18] sm:$0xff] %vm590_vm3, %v2760_v15  ;;  %v845_v20 = vsub.s32 0, %v844_v19  ;;  %s2763_s13 = smov 80   ;;  %s2764_s6 = smov 72  }
  0x60   : > { %2360 = vmatpush3.msra.mxu1 %v685_v5  ;;  %2349 = vmatpush3.msra.mxu0 %v606_v6  ;;  %595 = vst.msk [vmem:[#allocation3] sm:$0xff] %vm590_vm3, %v2754_v0  ;;  %596 = vst.msk [vmem:[#allocation3 + $0x8] sm:$0xff] %vm590_vm3, %v2754_v0  ;;  %s585_s24 = scalar_lea.vmem %s3278_s2, %s581_s19  ;;  %s3321_s23 = sld [smem:[#allocation23_spill]] }
  0x61   : > { %2361 = vmatprep.subr.mxu1 %v2754_v0  ;;  %2350 = vmatprep.subr.mxu0 %v2754_v0  ;;  %597 = vst.msk [vmem:[#allocation3 + $0x10] sm:$0xff] %vm590_vm3, %v2754_v0  ;;  %598 = vst.msk [vmem:[#allocation3 + $0x18] sm:$0xff] %vm590_vm3, %v2754_v0  ;;  %v761_v18 = vld [vmem:[%s585_s24] sm:$0x1]  ;;  %s3324_s19 = sld [smem:[#allocation26_spill]]  ;;  %s2293_s26 = sshll.u32 %s2739_s16, 7 }
  0x62   : > { %2362 = vmatpush3.msra.mxu1 %v684_v7  ;;  %2351 = vmatpush3.msra.mxu0 %v605_v8  ;;  %vm762_vm4 = vcmp.eq.s32.totalorder %v761_v18, 0  ;;  %s579_s22 = scalar_lea.vmem [#allocation11], %s2970_s12  ;;  %s2110_s11 = scalar_lea.sflag [#allocation7], %s2967_s7 }
  0x63   : > { %2364 = vmatmul.mubr.msk.f32.vlgmr.msra.gmra.mxu1 %vm609_vm1, %v683_v9  ;;  %2353 = vmatmul.mubr.msk.f32.vlgmr.msra.gmra.mxu0 %vm609_vm1, %v3024_v10  ;;  %v763_v21 = vsel %vm762_vm4, -1e+09, %v2754_v0  ;;  %s2124_s24 = sshll.u32 %s579_s22, 4  ;;  %s2765_s29 = smov [#allocation11]   ;;  %s2125_s24 = int_to_ptr.vmem [resolvable:$true] %s2124_s24 }
  0x64   : > { %2366 = vmatprep.subr.mxu0 %v2754_v0  ;;  %2368 = vmatprep.mubr.msk.f32.mxu0 %vm2755_vm0, %v2754_v0  ;;  %v846_v22 = vrot.slane %v763_v21, %v845_v20 }
  0x65   : > { %2381 = vmatprep.subr.mxu1 %v2754_v0  ;;  %2383 = vmatprep.mubr.msk.f32.mxu1 %vm2755_vm0, %v2754_v0  ;;  %v3077_v29 = vld [vmem:[#allocation2] sm:$0xff]  ;;  %v1040_v60 = vld [vmem:[#allocation2 + $0x8] sm:$0xff] }
  0x66   : > { %2547 = vset.pattern.permute.xlu0 %v2761_v28  ;;  %2548 = vset.pattern.permute.xlu1 %v2761_v28  ;;  %v1232_v63 = vld [vmem:[#allocation2 + $0x10] sm:$0xff]  ;;  %v1424_v3 = vld [vmem:[#allocation2 + $0x18] sm:$0xff] }
 0x123   : > { %v3045_v11 = vpop.f32.mrf.mxu1  ;;  %v679_v12 = vpop.f32.mrf.mxu0 }
 0x124   : > { %880 = vrot.lane.b32.xlu1 %v3045_v11, %s2756_s25  ;;  %2367 = vmatpush3.xpose.msk.msra.mxu0 %vm599_vm2, %v3045_v11  ;;  %s2663_s25 = sshll.u32 %s2765_s29, 4  ;;  %s2664_s25 = int_to_ptr.vmem [resolvable:$false] %s2663_s25 }
 0x125   : > { %v2365_v13 = vpop.f32.mrf.mxu1  ;;  %v2354_v14 = vpop.f32.mrf.mxu0  ;;  %2371 = vmatprep.subr.mxu0 %v2754_v0  ;;  %s2665_s16 = scalar_lea.vmem %s2664_s25, 256  ;;  %p2666_p5 = scmp.lt.s32.totalorder %s2125_s24, %s2664_s25 }
 0x127   : > { %2369 = vmatmul.mubr.msk.f32.vlgmr.msra.gmra.mxu0 %vm599_vm2, %v679_v12 }
 0x128   : > { %961 = vrot.lane.b32.xlu1 %v3045_v11, %s2757_s28  ;;  %2373 = vmatprep.mubr.msk.f32.mxu0 %vm2755_vm0, %v2754_v0 }
 0x12c   : > { %959 = vrot.lane.b32.xlu1 %v679_v12, %s2757_s28  ;;  %s3319_s28 = sld [smem:[#allocation24_spill]] }
 0x130   : > { %1153 = vrot.lane.b32.xlu1 %v3045_v11, %s2758_s14 }
 0x134   : > { %1151 = vrot.lane.b32.xlu1 %v679_v12, %s2758_s14 }
 0x138   : > { %1345 = vrot.lane.b32.xlu1 %v3045_v11, %s2759_s27 }
 0x13c   : > { %1343 = vrot.lane.b32.xlu1 %v679_v12, %s2759_s27 }
 0x196   : > { %v881_v16 = vpop.permute.xlu1 %880 }
 0x197   : > { %2372 = vmatpush3.msra.mxu0 %v881_v16 }
 0x198   : > { %2376 = vmatprep.subr.mxu0 %v2754_v0 }
 0x19a   : > { %v962_v33 = vpop.permute.xlu1 %961 }
 0x19e   : > { %v960_v37 = vpop.permute.xlu1 %959 }
 0x1a2   : > { %v1154_v38 = vpop.permute.xlu1 %1153 }
 0x1a6   : > { %v1152_v40 = vpop.permute.xlu1 %1151 }
 0x1aa   : > { %v1346_v41 = vpop.permute.xlu1 %1345 }
 0x1ae   : > { %v1344_v42 = vpop.permute.xlu1 %1343 }
 0x1e7   : > { %v837_v23 = vpop.f32.mrf.mxu0 }
 0x1e8   : > { %v841_v24 = vmul.f32 0.35355338, %v837_v23 }
 0x1e9   : > { %v2370_v25 = vpop.f32.mrf.mxu0 }
 0x1ea   : > { %v848_v26 = vadd.f32 %v846_v22, %v841_v24 }
 0x1ec   : > { %v850_v27 = vsel %vm599_vm2, %v848_v26, -inf }
 0x1ed   : > { %851 = vmax.xlane.f32.xlu0 %v850_v27 }
 0x276   : > { %v852_v30 = vpop.xlane.xlu0 %851 }
 0x277   : > { %v3080_v31 = vmax.f32 %v3077_v29, %v852_v30 }
 0x279   : > { %v854_v32 = vsub.f32 %v3077_v29, %v3080_v31  ;;  %958 = vst.msk [vmem:[#allocation2] sm:$0xff] %vm590_vm3, %v3080_v31  ;;  %859 = vperm.xlu0 %2547, %v3080_v31   ;;  %v1057_v29 = vld [vmem:[#allocation3 + $0x8] sm:$0xff] }
 0x2f4   : > { %v860_v34 = vpop.permute.xlu0 %859 }
 0x2f5   : > { %v862_v35 = vsub.f32 %v848_v26, %v860_v34 }
 0x2f7   : > { %v863_v36 = vmul.f32 1.442695, %v862_v35 }
 0x2f9   : > { %2549 = vpow2.f32 %v863_v36 }
 0x306   : > { %v2550_v39 = vpop.eup %2549 }
 0x307   : > { %2374 = vmatmul.mubr.msk.f32.vlgmr.msra.gmra.mxu0 %vm599_vm2, %v2550_v39  ;;  %v867_v9 = vsel %vm599_vm2, %v2550_v39, 0.0 }
 0x308   : > { %2377 = vmatpush3.xpose.msk.msra.mxu0 %vm599_vm2, %v962_v33  ;;  %2378 = vmatprep.mubr.msk.f32.mxu0 %vm2755_vm0, %v2754_v0 }
 0x309   : > { %2386 = vmatprep.subr.mxu0 %v2754_v0 }
 0x30b   : > { %2379 = vmatmul.mubr.msk.f32.vlgmr.msra.gmra.mxu0 %vm599_vm2, %v960_v37 }
 0x30c   : > { %2387 = vmatpush3.xpose.msk.msra.mxu0 %vm599_vm2, %v1154_v38  ;;  %2388 = vmatprep.mubr.msk.f32.mxu0 %vm2755_vm0, %v2754_v0  ;;  %v855_v38 = vmul.f32 1.442695, %v854_v32 }
 0x30d   : > { %2396 = vmatprep.subr.mxu0 %v2754_v0 }
 0x30f   : > { %2389 = vmatmul.mubr.msk.f32.vlgmr.msra.gmra.mxu0 %vm599_vm2, %v1152_v40  ;;  %v865_v40 = vld [vmem:[#allocation3] sm:$0xff] }
 0x310   : > { %2397 = vmatpush3.xpose.msk.msra.mxu0 %vm599_vm2, %v1346_v41  ;;  %2398 = vmatprep.mubr.msk.f32.mxu0 %vm2755_vm0, %v2754_v0 }
 0x311   : > { %2406 = vmatprep.subr.mxu0 %v2754_v0 }
 0x313   : > { %2399 = vmatmul.mubr.msk.f32.vlgmr.msra.gmra.mxu0 %vm599_vm2, %v1344_v42 }
 0x314   : > { %2408 = vmatprep.mubr.msk.f32.mxu0 %vm2755_vm0, %v2754_v0 }
 0x3c7   : > { %v3105_v43 = vpop.f32.mrf.mxu0 }
 0x3c9   : > { %v2375_v44 = vpop.f32.mrf.mxu0 }
 0x3cb   : > { %v1033_v45 = vpop.f32.mrf.mxu0 }
 0x3cc   : > { %v1037_v46 = vmul.f32 0.35355338, %v1033_v45 }
 0x3cd   : > { %v2380_v47 = vpop.f32.mrf.mxu0 }
 0x3ce   : > { %v1038_v48 = vadd.f32 %v1037_v46, %v846_v22  ;;  %v1548_v46 = vld [vmem:[%s3281_s5] sm:$0xff] }
 0x3cf   : > { %v1225_v49 = vpop.f32.mrf.mxu0 }
 0x3d0   : > { %v1229_v50 = vmul.f32 0.35355338, %v1225_v49  ;;  %v1041_v51 = vsel %vm599_vm2, %v1038_v48, -inf }
 0x3d1   : > { %1042 = vmax.xlane.f32.xlu1 %v1041_v51  ;;  %v2390_v52 = vpop.f32.mrf.mxu0 }
 0x3d2   : > { %v1230_v53 = vadd.f32 %v1229_v50, %v846_v22  ;;  %v1441_v52 = vld [vmem:[#allocation3 + $0x18] sm:$0xff] }
 0x3d3   : > { %v1417_v54 = vpop.f32.mrf.mxu0 }
 0x3d4   : > { %v1421_v55 = vmul.f32 0.35355338, %v1417_v54  ;;  %v1233_v56 = vsel %vm599_vm2, %v1230_v53, -inf }
 0x3d5   : > { %1234 = vmax.xlane.f32.xlu0 %v1233_v56  ;;  %v2400_v57 = vpop.f32.mrf.mxu0 }
 0x3d6   : > { %v1422_v58 = vadd.f32 %v1421_v55, %v846_v22 }
 0x3d8   : > { %v1425_v59 = vsel %vm599_vm2, %v1422_v58, -inf }
 0x3d9   : > { %1426 = vmax.xlane.f32.xlu1 %v1425_v59 }
 0x45a   : > { %v1043_v61 = vpop.xlane.xlu1 %1042 }
 0x45b   : > { %v1044_v62 = vmax.f32 %v1040_v60, %v1043_v61 }
 0x45d   : > { %1150 = vst.msk [vmem:[#allocation2 + $0x8] sm:$0xff] %vm590_vm3, %v1044_v62  ;;  %1050 = vperm.xlu1 %2548, %v1044_v62   ;;  %v1045_v6 = vsub.f32 %v1040_v60, %v1044_v62 }
 0x45e   : > { %v1235_v1 = vpop.xlane.xlu0 %1234 }
 0x45f   : > { %v1236_v2 = vmax.f32 %v1232_v63, %v1235_v1  ;;  %v1046_v7 = vmul.f32 1.442695, %v1045_v6  ;;  %v1558_v1 = vld [vmem:[%s3281_s5 + $0x8] sm:$0xff] }
 0x460   : > { %2407 = vmatpush3.msra.mxu0 %v1558_v1  ;;  %v1065_v6 = vld [vmem:[#allocation4 + $0x8] sm:$0xff] }
 0x461   : > { %1342 = vst.msk [vmem:[#allocation2 + $0x10] sm:$0xff] %vm590_vm3, %v1236_v2  ;;  %1242 = vperm.xlu0 %2547, %v1236_v2   ;;  %v1237_v8 = vsub.f32 %v1232_v63, %v1236_v2  ;;  %2551 = vpow2.f32 %v1046_v7  ;;  %2416 = vmatprep.subr.mxu0 %v2754_v0 }
 0x462   : > { %v1427_v4 = vpop.xlane.xlu1 %1426 }
 0x463   : > { %v1428_v5 = vmax.f32 %v1424_v3, %v1427_v4  ;;  %v1238_v12 = vmul.f32 1.442695, %v1237_v8  ;;  %v1257_v8 = vld [vmem:[#allocation4 + $0x10] sm:$0xff] }
 0x465   : > { %1534 = vst.msk [vmem:[#allocation2 + $0x18] sm:$0xff] %vm590_vm3, %v1428_v5  ;;  %1434 = vperm.xlu1 %2548, %v1428_v5   ;;  %v1429_v13 = vsub.f32 %v1424_v3, %v1428_v5  ;;  %2553 = vpow2.f32 %v1238_v12 }
 0x467   : > { %v1430_v14 = vmul.f32 1.442695, %v1429_v13 }
 0x469   : > { %1072 = vrot.lane.b32.xlu1 %v3045_v11, %s2762_s9  ;;  %2555 = vpow2.f32 %v1430_v14 }
 0x46d   : > { %1264 = vrot.lane.b32.xlu1 %v3045_v11, %s2763_s13 }
 0x46e   : > { %v2552_v15 = vpop.eup %2551 }
 0x46f   : > { %v1058_v31 = vmul.f32 %v2552_v15, %v1057_v29 }
 0x471   : > { %1456 = vrot.lane.b32.xlu1 %v3045_v11, %s2764_s6  ;;  %s3320_s6 = sld [smem:[#allocation22_spill]] }
 0x472   : > { %v2554_v16 = vpop.eup %2553 }
 0x476   : > { %v3117_v17 = vpop.eup %2555 }
 0x477   : > { %v1442_v54 = vmul.f32 %v3117_v17, %v1441_v52 }
 0x495   : > { %868 = vadd.xlane.f32.xlu1 %v867_v9 }
 0x4a6   : > { %1068 = vperm.xlu1 %2548, %v2552_v15  }
 0x4aa   : > { %1260 = vperm.xlu1 %2548, %v2554_v16  }
 0x4ae   : > { %1452 = vperm.xlu1 %2548, %v3117_v17  }
 0x4d8   : > { %v1051_v11 = vpop.permute.xlu1 %1050 }
 0x4d9   : > { %v1053_v18 = vsub.f32 %v1038_v48, %v1051_v11  ;;  %v1249_v48 = vld [vmem:[#allocation3 + $0x10] sm:$0xff] }
 0x4da   : > { %v1250_v50 = vmul.f32 %v2554_v16, %v1249_v48  ;;  %v1449_v16 = vld [vmem:[#allocation4 + $0x18] sm:$0xff] }
 0x4db   : > { %v1054_v19 = vmul.f32 1.442695, %v1053_v18 }
 0x4dc   : > { %v1243_v20 = vpop.permute.xlu0 %1242 }
 0x4dd   : > { %2557 = vpow2.f32 %v1054_v19  ;;  %v1245_v21 = vsub.f32 %v1230_v53, %v1243_v20 }
 0x4df   : > { %v1246_v22 = vmul.f32 1.442695, %v1245_v21 }
 0x4e0   : > { %v1435_v23 = vpop.permute.xlu1 %1434 }
 0x4e1   : > { %2559 = vpow2.f32 %v1246_v22  ;;  %v1437_v24 = vsub.f32 %v1422_v58, %v1435_v23  ;;  %v873_v58 = vld [vmem:[#allocation4] sm:$0xff] }
 0x4e3   : > { %v1438_v25 = vmul.f32 1.442695, %v1437_v24  ;;  %v1798_v24 = vld [vmem:[%s3281_s5 + $0x18] sm:$0xff] }
 0x4e4   : > { %v1073_v26 = vpop.permute.xlu1 %1072 }
 0x4e5   : > { %2561 = vpow2.f32 %v1438_v25  ;;  %2382 = vmatpush3.msra.mxu1 %v1073_v26 }
 0x4e6   : > { %2391 = vmatprep.subr.mxu1 %v2754_v0  ;;  %2563 = vpow2.f32 %v855_v38 }
 0x4e8   : > { %v1265_v27 = vpop.permute.xlu1 %1264 }
 0x4ea   : > { %v2558_v28 = vpop.eup %2557 }
 0x4eb   : > { %2384 = vmatmul.mubr.msk.f32.vlgmr.msra.gmra.mxu1 %vm599_vm2, %v2558_v28  ;;  %v1059_v30 = vsel %vm599_vm2, %v2558_v28, 0.0 }
 0x4ec   : > { %2392 = vmatpush3.msra.mxu1 %v1265_v27  ;;  %1060 = vadd.xlane.f32.xlu0 %v1059_v30  ;;  %v1457_v34 = vpop.permute.xlu1 %1456 }
 0x4ed   : > { %2393 = vmatprep.mubr.msk.f32.mxu1 %vm2755_vm0, %v2754_v0  ;;  %2401 = vmatprep.subr.mxu1 %v2754_v0 }
 0x4ee   : > { %v2560_v33 = vpop.eup %2559 }
 0x4ef   : > { %2394 = vmatmul.mubr.msk.f32.vlgmr.msra.gmra.mxu1 %vm599_vm2, %v2560_v33  ;;  %v1251_v35 = vsel %vm599_vm2, %v2560_v33, 0.0  ;;  %v1714_v33 = vld [vmem:[%s3281_s5 + $0x10] sm:$0xff] }
 0x4f0   : > { %2402 = vmatpush3.msra.mxu1 %v1457_v34  ;;  %1252 = vadd.xlane.f32.xlu0 %v1251_v35 }
 0x4f1   : > { %2403 = vmatprep.mubr.msk.f32.mxu1 %vm2755_vm0, %v2754_v0  ;;  %2411 = vmatprep.subr.mxu1 %v2754_v0 }
 0x4f2   : > { %v2562_v36 = vpop.eup %2561 }
 0x4f3   : > { %2404 = vmatmul.mubr.msk.f32.vlgmr.msra.gmra.mxu1 %vm599_vm2, %v2562_v36  ;;  %v1443_v37 = vsel %vm599_vm2, %v2562_v36, 0.0  ;;  %v2564_v39 = vpop.eup %2563 }
 0x4f4   : > { %1444 = vadd.xlane.f32.xlu0 %v1443_v37  ;;  %2413 = vmatprep.mubr.msk.f32.mxu1 %vm2755_vm0, %v2754_v0  ;;  %v866_v41 = vmul.f32 %v2564_v39, %v865_v40 }
 0x4f5   : > { %2412 = vmatpush3.msra.mxu1 %v1548_v46 }
 0x4f6   : > { %2421 = vmatprep.subr.mxu1 %v2754_v0 }
 0x50a   : > { %876 = vperm.xlu0 %2547, %v2564_v39  }
 0x51e   : > { %v869_v42 = vpop.xlane.xlu1 %868 }
 0x51f   : > { %v870_v44 = vadd.f32 %v869_v42, %v866_v41 }
 0x521   : > { %872 = vst.msk [vmem:[#allocation3] sm:$0xff] %vm590_vm3, %v870_v44 }
 0x522   : > { %v1069_v5 = vpop.permute.xlu1 %1068 }
 0x526   : > { %v1261_v7 = vpop.permute.xlu1 %1260 }
 0x527   : > { %v1263_v14 = vmul.f32 %v1261_v7, %v1257_v8  ;;  %v2285_v7 = vld [vmem:[%s3319_s28] ss:$0 sm:$0xff]  ;;  %s3323_s28 = sld [smem:[#allocation25_spill]] }
 0x528   : > { %v1539_v45 = vld [vmem:[#allocation3] sm:$0xff] }
 0x529   : > { %2565 = vrcp.f32 %v1539_v45 }
 0x52a   : > { %v1453_v15 = vpop.permute.xlu1 %1452 }
 0x52b   : > { %v1455_v19 = vmul.f32 %v1453_v15, %v1449_v16 }
 0x536   : > { %v2566_v47 = vpop.eup %2565 }
 0x537   : > { %1544 = vperm.xlu1 %2548, %v2566_v47  }
 0x575   : > { %v1061_v32 = vpop.xlane.xlu0 %1060 }
 0x576   : > { %v1062_v49 = vadd.f32 %v1061_v32, %v1058_v31 }
 0x578   : > { %1063 = vst.msk [vmem:[#allocation3 + $0x8] sm:$0xff] %vm590_vm3, %v1062_v49 }
 0x579   : > { %v1253_v51 = vpop.xlane.xlu0 %1252 }
 0x57a   : > { %v1254_v53 = vadd.f32 %v1253_v51, %v1250_v50 }
 0x57c   : > { %1255 = vst.msk [vmem:[#allocation3 + $0x10] sm:$0xff] %vm590_vm3, %v1254_v53 }
 0x57d   : > { %v1445_v55 = vpop.xlane.xlu0 %1444 }
 0x57e   : > { %v1446_v56 = vadd.f32 %v1445_v55, %v1442_v54 }
 0x57f   : > { %v1549_v57 = vld [vmem:[#allocation3 + $0x8] sm:$0xff] }
 0x580   : > { %1447 = vst.msk [vmem:[#allocation3 + $0x18] sm:$0xff] %vm590_vm3, %v1446_v56  ;;  %2567 = vrcp.f32 %v1549_v57  ;;  %v1907_v56 = vld [vmem:[#allocation10 + $0x18] sm:$0xff]  ;;  %v1906_v57 = vld [vmem:[#allocation10 + $0x10] sm:$0xff] }
 0x583   : > { %v1705_v59 = vld [vmem:[#allocation3 + $0x10] sm:$0xff] }
 0x584   : > { %2569 = vrcp.f32 %v1705_v59  ;;  %v1996_v59 = vld [vmem:[%s3284_s8 + $0x38] sm:$0xff] }
 0x585   : > { %v877_v60 = vpop.permute.xlu0 %876 }
 0x586   : > { %v879_v61 = vmul.f32 %v877_v60, %v873_v58  ;;  %v1905_v58 = vld [vmem:[#allocation10 + $0x8] sm:$0xff]  ;;  %v1995_v60 = vld [vmem:[%s3284_s8 + $0x30] sm:$0xff] }
 0x587   : > { %v1789_v62 = vld [vmem:[#allocation3 + $0x18] sm:$0xff] }
 0x588   : > { %v956_v63 = vadd.f32 %v3105_v43, %v879_v61  ;;  %2571 = vrcp.f32 %v1789_v62  ;;  %v1071_v43 = vmul.f32 %v1069_v5, %v1065_v6  ;;  %v1994_v61 = vld [vmem:[%s3284_s8 + $0x28] sm:$0xff]  ;;  %v1993_v62 = vld [vmem:[%s3284_s8 + $0x20] sm:$0xff] }
 0x589   : > { %v2284_v5 = vld [vmem:[%s3286_s10] ss:$0 sm:$0xff] }
 0x58a   : > { %957 = vst.msk [vmem:[#allocation4] sm:$0xff] %vm599_vm2, %v956_v63  ;;  %v1992_v63 = vld [vmem:[%s3284_s8 + $0x18] sm:$0xff] }
 0x58d   : > { %v2568_v2 = vpop.eup %2567 }
 0x58e   : > { %1554 = vperm.xlu0 %2547, %v2568_v2  }
 0x591   : > { %v2570_v3 = vpop.eup %2569  ;;  %v1541_v20 = vld [vmem:[#allocation4] sm:$0xff] }
 0x592   : > { %1710 = vperm.xlu0 %2547, %v2570_v3  }
 0x595   : > { %v2572_v4 = vpop.eup %2571 }
 0x596   : > { %1794 = vperm.xlu1 %2548, %v2572_v4  }
 0x5ab   : > { %v1144_v9 = vpop.f32.mrf.mxu1 }
 0x5ac   : > { %v1148_v12 = vadd.f32 %v1144_v9, %v1071_v43  ;;  %v1991_v9 = vld [vmem:[%s3284_s8 + $0x10] sm:$0xff] }
 0x5ad   : > { %v2385_v13 = vpop.f32.mrf.mxu1 }
 0x5ae   : > { %1149 = vst.msk [vmem:[#allocation4 + $0x8] sm:$0xff] %vm599_vm2, %v1148_v12  ;;  %v1990_v12 = vld [vmem:[%s3284_s8 + $0x8] sm:$0xff]  ;;  %v1989_v13 = vld [vmem:[%s3284_s8] sm:$0xff] }
 0x5af   : > { %v1336_v17 = vpop.f32.mrf.mxu1 }
 0x5b0   : > { %v1340_v11 = vadd.f32 %v1336_v17, %v1263_v14  ;;  %v2286_v14 = vld [vmem:[%s3320_s6] ss:$0 sm:$0xff]  ;;  %s3325_s6 = sld [smem:[#allocation27_spill]] }
 0x5b1   : > { %v2395_v18 = vpop.f32.mrf.mxu1 }
 0x5b2   : > { %1341 = vst.msk [vmem:[#allocation4 + $0x10] sm:$0xff] %vm599_vm2, %v1340_v11  ;;  %v1545_v21 = vpop.permute.xlu1 %1544  ;;  %v2288_v18 = vld [vmem:[%s3321_s23] ss:$0 sm:$0xff]  ;;  %s2659_s23 = scalar_lea.vmem %s2125_s24, 128 }
 0x5b3   : > { %v1547_v22 = vmul.f32 %v1545_v21, %v1541_v20  ;;  %v1528_v23 = vpop.f32.mrf.mxu1  ;;  %p2660_p4 = scmp.ne.s32.totalorder %s2125_s24, %s2659_s23  ;;  %p2667_p7 = scmp.lt.s32.totalorder %s2665_s16, %s2659_s23 }
 0x5b4   : > { %v1532_v25 = vadd.f32 %v1528_v23, %v1455_v19 }
 0x5b5   : > { %v2405_v26 = vpop.f32.mrf.mxu1  ;;  %2414 = vmatmul.mubr.msk.f32.vlgmr.msra.gmra.mxu1 %vm599_vm2, %v1547_v22  ;;  %v1551_v27 = vld [vmem:[#allocation4 + $0x8] sm:$0xff]  ;;  %p2661_p8 = pnand %p2660_p4, %p2924_p0  ;;  %p2668_p3 = por %p2667_p7, %p2666_p5 }
 0x5b6   : > { %1533 = vst.msk [vmem:[#allocation4 + $0x18] sm:$0xff] %vm599_vm2, %v1532_v25  ;;  %2422 = vmatpush3.msra.mxu1 %v1798_v24  ;;  %2423 = vmatprep.mubr.msk.f32.mxu1 %vm2755_vm0, %v2754_v0  ;;  %s2122_s17 = scalar_lea.hbm %s3325_s6, %s2293_s26 }
 0x5b7   : > { %2437 = vmatprep.subr.mxu1 %v2754_v0  ;;  %p2662_p10 = pneg %p2661_p8 }
 0x5b9   : > { %v1707_v34 = vld [vmem:[#allocation4 + $0x10] sm:$0xff]  ;;  %p2669_p2 = pnand %p2668_p3, %p2662_p10 }
 0x5bd   : > { %v1791_v37 = vld [vmem:[#allocation4 + $0x18] sm:$0xff] }
 0x609   : > { %v1555_v28 = vpop.permute.xlu0 %1554 }
 0x60a   : > { %v1557_v30 = vmul.f32 %v1555_v28, %v1551_v27 }
 0x60c   : > { %2409 = vmatmul.mubr.msk.f32.vlgmr.msra.gmra.mxu0 %vm599_vm2, %v1557_v30 }
 0x60d   : > { %v1711_v35 = vpop.permute.xlu0 %1710  ;;  %2417 = vmatpush3.msra.mxu0 %v1714_v33  ;;  %2418 = vmatprep.mubr.msk.f32.mxu0 %vm2755_vm0, %v2754_v0 }
 0x60e   : > { %v1713_v36 = vmul.f32 %v1711_v35, %v1707_v34  ;;  %2426 = vmatprep.subr.mxu0 %v2754_v0  ;;  %v2290_v35 = vld [vmem:[%s3323_s28] ss:$0 sm:$0xff] }
 0x610   : > { %2419 = vmatmul.mubr.msk.f32.vlgmr.msra.gmra.mxu0 %vm599_vm2, %v1713_v36 }
 0x611   : > { %v1795_v38 = vpop.permute.xlu1 %1794  ;;  %2434 = vmatprep.mubr.msk.f32.mxu0 %vm2755_vm0, %v2754_v0  ;;  %2427 = vmatpush3.msra.mxu0 %v1907_v56 }
 0x612   : > { %v1797_v39 = vmul.f32 %v1795_v38, %v1791_v37  ;;  %2428 = vmatprep.subr.mxu0 %v2754_v0  ;;  %v2291_v37 = vld [vmem:[%s3324_s19] ss:$0 sm:$0xff] }
 0x613   : > { %2429 = vmatpush3.msra.mxu0 %v1906_v57 }
 0x614   : > { %2424 = vmatmul.mubr.msk.f32.vlgmr.msra.gmra.mxu1 %vm599_vm2, %v1797_v39  ;;  %2430 = vmatprep.subr.mxu0 %v2754_v0 }
 0x615   : > { %2453 = vmatprep.mubr.msk.f32.mxu1 %vm2755_vm0, %v2754_v0  ;;  %2431 = vmatpush3.msra.mxu0 %v1905_v58 }
 0x616   : > { %2432 = vmatprep.subr.mxu0 %v2754_v0  ;;  %2438 = vmatpush3.msra.mxu1 %v1996_v59 }
 0x617   : > { %2439 = vmatprep.subr.mxu1 %v2754_v0 }
 0x618   : > { %2440 = vmatpush3.msra.mxu1 %v1995_v60 }
 0x619   : > { %2441 = vmatprep.subr.mxu1 %v2754_v0 }
 0x61a   : > { %2442 = vmatpush3.msra.mxu1 %v1994_v61 }
 0x61b   : > { %2443 = vmatprep.subr.mxu1 %v2754_v0 }
 0x61c   : > { %2444 = vmatpush3.msra.mxu1 %v1993_v62 }
 0x61d   : > { %2445 = vmatprep.subr.mxu1 %v2754_v0 }
 0x61e   : > { %2446 = vmatpush3.msra.mxu1 %v1992_v63 }
 0x61f   : > { %2447 = vmatprep.subr.mxu1 %v2754_v0 }
 0x620   : > { %2448 = vmatpush3.msra.mxu1 %v1991_v9 }
 0x621   : > { %2449 = vmatprep.subr.mxu1 %v2754_v0 }
 0x622   : > { %2450 = vmatpush3.msra.mxu1 %v1990_v12 }
 0x623   : > { %2451 = vmatprep.subr.mxu1 %v2754_v0 }
 0x624   : > { %2452 = vmatpush3.msra.mxu1 %v1989_v13 }
 0x675   : > { %v1701_v40 = vpop.f32.mrf.mxu1 }
 0x677   : > { %v2415_v41 = vpop.f32.mrf.mxu1 }
 0x6cc   : > { %v1628_v42 = vpop.f32.mrf.mxu0 }
 0x6cd   : > { %v1702_v46 = vadd.f32 %v1701_v40, %v1628_v42 }
 0x6ce   : > { %v2410_v44 = vpop.f32.mrf.mxu0 }
 0x6d0   : > { %v1784_v45 = vpop.f32.mrf.mxu0 }
 0x6d1   : > { %v1788_v29 = vadd.f32 %v1784_v45, %v1702_v46 }
 0x6d2   : > { %v2420_v47 = vpop.f32.mrf.mxu0 }
 0x6d4   : > { %v1868_v31 = vpop.f32.mrf.mxu1 }
 0x6d5   : > { %v1872_v32 = vadd.f32 %v1868_v31, %v1788_v29 }
 0x6d6   : > { %v2425_v48 = vpop.f32.mrf.mxu1 }
 0x6d7   : > { %v1873_v49 = vadd.f32 %v1872_v32, %v3024_v10  ;;  %v1904_v10 = vld [vmem:[#allocation10] sm:$0xff] }
 0x6d8   : > { %2433 = vmatpush3.msra.mxu0 %v1904_v10 }
 0x6d9   : > { %v1876_v50 = vsel %vm609_vm1, %v1873_v49, 0.0 }
 0x6da   : > { %1877 = vadd.xlane.f32.xlu0 %v1876_v50 }
 0x763   : > { %v1878_v51 = vpop.xlane.xlu0 %1877 }
 0x764   : > { %v1880_v52 = vmul.f32 0.03125, %v1878_v51 }
 0x766   : > { %v1881_v53 = vsub.f32 %v1873_v49, %v1880_v52 }
 0x768   : > { %v1882_v54 = vmul.f32 %v1881_v53, %v1881_v53 }
 0x76a   : > { %v1883_v55 = vsel %vm609_vm1, %v1882_v54, 0.0 }
 0x76b   : > { %1884 = vadd.xlane.f32.xlu1 %v1883_v55 }
 0x7f4   : > { %v1885_v1 = vpop.xlane.xlu1 %1884 }
 0x7f5   : > { %v1886_v2 = vmul.f32 0.03125, %v1885_v1 }
 0x7f7   : > { %v1887_v3 = vadd.f32 1e-06, %v1886_v2 }
 0x7f9   : > { %2573 = vrsqrt.f32 %v1887_v3 }
 0x806   : > { %v2574_v4 = vpop.eup %2573 }
 0x807   : > { %v1889_v6 = vmul.f32 %v2574_v4, %v1881_v53 }
 0x809   : > { %v1896_v43 = vmul.f32 %v2284_v5, %v1889_v6 }
 0x80b   : > { %v1903_v8 = vadd.f32 %v2285_v7, %v1896_v43 }
 0x80d   : > { %2435 = vmatmul.mubr.msk.f32.vlgmr.msra.gmra.mxu0 %vm609_vm1, %v1903_v8 }
 0x8cd   : > { %v1984_v15 = vpop.f32.mrf.mxu0 }
 0x8ce   : > { %v1985_v16 = vadd.f32 %v2286_v14, %v1984_v15 }
 0x8cf   : > { %v2436_v17 = vpop.f32.mrf.mxu0 }
 0x8d0   : > { %v1988_v11 = vmax.f32 %v1985_v16, 0.0 }
 0x8d2   : > { %2454 = vmatmul.mubr.msk.f32.vlgmr.msra.gmra.mxu1 %vm2004_vm5, %v1988_v11 }
 0x992   : > { %v2074_v19 = vpop.f32.mrf.mxu1 }
 0x993   : > { %v2075_v20 = vadd.f32 %v2288_v18, %v2074_v19 }
 0x994   : > { %v2455_v21 = vpop.f32.mrf.mxu1 }
 0x995   : > { %v2078_v22 = vadd.f32 %v2075_v20, %v1903_v8 }
 0x997   : > { %v2081_v0 = vsel %vm609_vm1, %v2078_v22, 0.0 }
 0x998   : > { %2082 = vadd.xlane.f32.xlu0 %v2081_v0 }
 0xa21   : > { %v2083_v23 = vpop.xlane.xlu0 %2082 }
 0xa22   : > { %v2084_v24 = vmul.f32 0.03125, %v2083_v23 }
 0xa24   : > { %v2085_v25 = vsub.f32 %v2078_v22, %v2084_v24 }
 0xa26   : > { %v2086_v26 = vmul.f32 %v2085_v25, %v2085_v25 }
 0xa28   : > { %v2087_v27 = vsel %vm609_vm1, %v2086_v26, 0.0 }
 0xa29   : > { %2088 = vadd.xlane.f32.xlu0 %v2087_v27 }
 0xab2   : > { %v2089_v28 = vpop.xlane.xlu0 %2088 }
 0xab3   : > { %v2090_v30 = vmul.f32 0.03125, %v2089_v28 }
 0xab5   : > { %v2091_v33 = vadd.f32 1e-06, %v2090_v30 }
 0xab7   : > { %2575 = vrsqrt.f32 %v2091_v33 }
 0xac4   : > { %v2576_v34 = vpop.eup %2575 }
 0xac5   : > { %v2093_v36 = vmul.f32 %v2576_v34, %v2085_v25 }
 0xac7   : > { %v2100_v38 = vmul.f32 %v2290_v35, %v2093_v36 }
 0xac9   : > { %v2107_v39 = vadd.f32 %v2291_v37, %v2100_v38 }
 0xacb   : > { %2108 = vst.msk [vmem:[%s579_s22] sm:$0xff] %vm609_vm1, %v2107_v39 }
 0xacc   : > { %2672 = shalt.err (!%p2669_p2)
}
 0xacd   : > { %s2673_s12 = scalar_lea.hbm %s2122_s17, 128  ;;  %s2677_s14 = scalar_lea.hbm %s3325_s6, 256 }
 0xace   : > { %p2674_p6 = scmp.ne.s32.totalorder %s2122_s17, %s2673_s12  ;;  %p2678_p13 = scmp.lt.s32.totalorder %s2122_s17, %s3325_s6 }
 0xacf   : > { %p2679_p11 = scmp.lt.s32.totalorder %s2677_s14, %s2673_s12 }
 0xad0   : > { %p2675_p9 = pnand %p2674_p6, %p2924_p0 }
 0xad1   : > { %p2680_p1 = por %p2679_p11, %p2678_p13 }
 0xad2   : > { %p2676_p12 = pneg %p2675_p9 }
 0xad4   : > { %p2681_p4 = pnand %p2680_p1, %p2676_p12 }
 0xad6   : > { %2684 = shalt.err (!%p2681_p4)
}
 0xad7   : > { %2464 = dma.vmem_to_hbm [thread:$0]  (%p2924_p0), %s2125_s24, 128, %s2122_s17, %s2110_s11  }
 0xad8 PF: > { %s3326_s26 = sld [smem:[#allocation16_spill]]  ;;  %p3329_p10 = scmp.ge.s32.totalorder %s2747_s18, 2 }
 0xad9   : > { %s3327_s22 = sld [smem:[#allocation18_spill]] }
 0xade   : > { %s2136_s9 = sand.u32 1, %s3326_s26  }
 0xadf   : > { %p3328_p8 = scmp.ne.s32.totalorder %s3327_s22, 0  ;;  %s2137_s13 = scalar_lea.sflag [#allocation7], %s2136_s9 }
 0xae1   : > { %p2478_p5 = pnand %p3329_p10, %p3328_p8 }
 0xae3   : > { %p2479_p7 = pneg %p2478_p5 }
 0xae5   : > { %2722 = dma.done.wait (%p2479_p7), %s2137_s13, 128  }
 0xae6   : > { %2724 = vsyncadd (%p2479_p7), %s2137_s13, 4294967168  ;;  %s33_s18 = sadd.s32 1, %s2747_s18   ;;  %s3330_s16 = sld [smem:[#allocation17_spill]] }
 0xae7   : > { %p30_p3 = scmp.ge.s32.totalorder %s33_s18, 4   ;;  %s3331_s17 = sld [smem:[#allocation19_spill]] }
 0xae8   : > { %s3332_s29 = smov %s2731_s30  ;;  %s3333_s30 = smov %s2735_s15 }
 0xae9   : > { %s3334_s15 = smov %s2933_s20  ;;  %32 = sbr.rel (!%p30_p3) target bundleno = 16 (0x10), region = 158 }
 0xaee   :  { %2142 = vsyncpa [#allocation6], 1 }
 0xaef   :  { %2144 = vsyncpa [#allocation6 + $0x1], 1 }
 0xaf0   :  { %2145 = vsyncpa [#allocation9], 1 }
 0xaf1   :  { %2147 = vsyncpa [#allocation9 + $0x1], 1 }
 0xaf2   :  { %2148 = vsyncpa [#allocation7], 1 }
 0xaf3   :  { %2150 = vsyncpa [#allocation7 + $0x1], 1 }

</bundles_post_ra>
